<compile_context>
chip_gen: v7x
topology: tpu7x:2x2x1
jax: 0.10.0
libtpu: 0.0.40
codegen_flags: <defaults>
</compile_context>

<pallas_src>
import math

import jax
import jax.numpy as jnp
from jax.experimental import pallas as pl
from jax.experimental.pallas import tpu as pltpu


_SINGLE_BLOCK_BYTES = 512 * 1024          # below this (logical bytes): one launch, one block
_MAX_SINGLE_VMEM_BYTES = 2 * 1024 * 1024  # padded-VMEM cap for the single-block path
_TARGET_BLOCK_BYTES = 2 * 1024 * 1024     # ~2 MiB blocks: near roofline, v5e-safe
_MIN_GRID_STEPS = 4                       # aim for >=4 steps so pipelining / 2 TCs engage


def _relu_kernel(x_ref, o_ref):
    x = x_ref[...]
    o_ref[...] = jnp.maximum(x, jnp.zeros((), dtype=x.dtype))


def _round_up(n, m):
    return -(-n // m) * m


@jax.jit
def relu_pallas(x: jax.Array) -> jax.Array:
    """ReLU(x) via a Pallas TPU kernel; works for any shape / rank / float dtype."""
    if x.size == 0:
        return x

    orig_shape = x.shape
    # Collapse leading dims only (free under TPU tiled layouts: the (sublane,
    # lane) tiling of the last two dims is untouched, so no relayout copy).
    if x.ndim >= 3:
        core = x.reshape(math.prod(orig_shape[:-2]), orig_shape[-2], orig_shape[-1])
    elif x.ndim == 2:
        core = x.reshape(1, orig_shape[0], orig_shape[1])
    else:  # 0-D / 1-D
        core = x.reshape(1, 1, x.size)

    L, S, C = core.shape
    itemsize = jnp.dtype(core.dtype).itemsize
    s_pad = _round_up(S, 8)
    c_pad = _round_up(C, 128)
    slab_bytes = s_pad * c_pad * itemsize          # padded VMEM bytes of one L-slice
    logical_bytes = L * S * C * itemsize

    if logical_bytes <= _SINGLE_BLOCK_BYTES and L * slab_bytes <= _MAX_SINGLE_VMEM_BYTES:
        # Tiny input (the module's actual workload): one full-array block, one step.
        block_shape = (L, S, C)
        grid = (1,)
        index_map = lambda i: (0, 0, 0)
        semantics = ("arbitrary",)
    elif slab_bytes <= _TARGET_BLOCK_BYTES:
        # Tile the collapsed leading axis: ~2 MiB blocks, but keep >= _MIN_GRID_STEPS
        # steps so DMA/compute overlap and megacore sharding actually engage.
        lblk = max(1, min(_TARGET_BLOCK_BYTES // slab_bytes,
                          -(-L // _MIN_GRID_STEPS)))
        block_shape = (lblk, S, C)
        grid = (pl.cdiv(L, lblk),)
        index_map = lambda i: (i, 0, 0)
        semantics = ("parallel",)
    else:
        # A single L-slice exceeds the block budget: tile the sublane axis too.
        sblk = (_TARGET_BLOCK_BYTES // (c_pad * itemsize)) // 8 * 8
        if sblk <= 0 or sblk >= S:
            sblk = S  # cannot / need not split further: use the full second-to-last dim
        block_shape = (1, sblk, C)
        grid = (L, pl.cdiv(S, sblk))
        index_map = lambda l, s: (l, s, 0)
        semantics = ("parallel", "parallel")

    out = pl.pallas_call(
        _relu_kernel,
        out_shape=jax.ShapeDtypeStruct(core.shape, core.dtype),
        grid_spec=pl.GridSpec(
            grid=grid,
            in_specs=[pl.BlockSpec(block_shape, index_map)],
            out_specs=pl.BlockSpec(block_shape, index_map),
        ),
        compiler_params=pltpu.CompilerParams(dimension_semantics=semantics),
    )(core)

    return out.reshape(orig_shape)


class M:
    """JAX/Pallas port of the PyTorch module (a single ReLU).

    Note: PyTorch's inplace=True has no functional-JAX equivalent; semantics
    (the returned values) are identical.
    """

    def __init__(self):
        pass  # ReLU has no parameters.

    def __call__(self, x226):
        x227 = relu_pallas(x226)
        return x227


if __name__ == "__main__":
    model = M()

    # Module's reference input shape: (1, 400, 7, 7) float32 (~78 KB).
    x226 = jax.random.normal(jax.random.PRNGKey(0), (1, 400, 7, 7), dtype=jnp.float32)
    out = jax.block_until_ready(model(x226))
    assert out.shape == x226.shape and out.dtype == x226.dtype
    assert jnp.allclose(out, jnp.maximum(x226, 0.0)), "mismatch (single-block path)"

    # Exercise the leading-axis tiled path (multi-step grid + ragged last block).
    x_big = jax.random.normal(jax.random.PRNGKey(1), (1, 499, 16, 64), dtype=jnp.float32)
    out_big = jax.block_until_ready(relu_pallas(x_big))
    assert jnp.allclose(out_big, jnp.maximum(x_big, 0.0)), "mismatch (tiled path)"

    # Exercise the sublane-tiled path (one leading slice larger than the block budget).
    x_wide = jax.random.normal(jax.random.PRNGKey(2), (1, 1, 1024, 768), dtype=jnp.float32)
    out_wide = jax.block_until_ready(relu_pallas(x_wide))
    assert jnp.allclose(out_wide, jnp.maximum(x_wide, 0.0)), "mismatch (sublane-tiled path)"

    print("KERNEL_OK")
</pallas_src>

<mosaic_0001>
module attributes {stable_mosaic.version = 11 : i64} {
  func.func @_relu_kernel(%arg0: i32, %arg1: memref<400x7x7xf32, #tpu.memory_space<vmem>>, %arg2: memref<400x7x7xf32, #tpu.memory_space<vmem>>) attributes {dimension_semantics = [#tpu.dimension_semantics<arbitrary>], iteration_bounds = array<i64: 1>, scalar_prefetch = 0 : i64, scratch_operands = 0 : i64, tpu.core_type = #tpu.core_type<tc>, window_params = [{pipeline_mode = #tpu.pipeline_mode<synchronous>, transform_indices = @transform_0, window_bounds = array<i64: 400, 7, 7>}, {pipeline_mode = #tpu.pipeline_mode<synchronous>, transform_indices = @transform_1, window_bounds = array<i64: 400, 7, 7>}]} {
    %c0 = arith.constant 0 : index
    %c0_0 = arith.constant 0 : index
    %c0_1 = arith.constant 0 : index
    %0 = vector.load %arg1[%c0, %c0_0, %c0_1] : memref<400x7x7xf32, #tpu.memory_space<vmem>>, vector<400x7x7xf32>
    %cst = arith.constant 0.000000e+00 : f32
    %1 = vector.broadcast %cst : f32 to vector<400x7x7xf32>
    %2 = arith.maximumf %0, %1 : vector<400x7x7xf32>
    %c0_2 = arith.constant 0 : index
    %c0_3 = arith.constant 0 : index
    %c0_4 = arith.constant 0 : index
    %3 = vector.load %arg2[%c0_2, %c0_3, %c0_4] : memref<400x7x7xf32, #tpu.memory_space<vmem>>, vector<400x7x7xf32>
    tpu.vector_store %arg2[%c0_2, %c0_3, %c0_4], %2 {strides = array<i32>} : memref<400x7x7xf32, #tpu.memory_space<vmem>>, vector<400x7x7xf32>,
    return
  }
  func.func @transform_0(%arg0: i32) -> (i32, i32, i32) {
    %c0_i32 = arith.constant 0 : i32
    %c0_i32_0 = arith.constant 0 : i32
    %c0_i32_1 = arith.constant 0 : i32
    %c0_i32_2 = arith.constant 0 : i32
    return %c0_i32, %c0_i32_0, %c0_i32_1 : i32, i32, i32
  }
  func.func @transform_1(%arg0: i32) -> (i32, i32, i32) {
    %c0_i32 = arith.constant 0 : i32
    %c0_i32_0 = arith.constant 0 : i32
    %c0_i32_1 = arith.constant 0 : i32
    %c0_i32_2 = arith.constant 0 : i32
    return %c0_i32, %c0_i32_0, %c0_i32_1 : i32, i32, i32
  }
}

</mosaic_0001>

<bundles_post_ra>
// kernel: relu_pallas.1
= control target key start
LH: loop header
LB: loop body
LE: loop exit
PB: predicated region body
PF: predicated region fallthrough
CT: control target
= control target key end

     0   :  { %vm808_vm0 = vcmask 55296   ;;  %s4023_s0 = inlined_call_operand.vmem [shape: f32[400,7,7], index: 0, kind: input, shape index: {}]   ;;  %s4024_s1 = inlined_call_operand.vmem [shape: f32[400,7,7], index: 1, kind: output, shape index: {}]  }
   0x1   :  { %v8_v0 = vld [vmem:[%s4023_s0] sm:$0x7f]  ;;  %v9_v1 = vld [vmem:[%s4023_s0 + $0x8] sm:$0x7f]  ;;  %v10_v2 = vld [vmem:[%s4023_s0 + $0x10] sm:$0x7f] }
   0x2   :  { %v408_v3 = vmax.f32 %v8_v0, 0.0  ;;  %v409_v4 = vmax.f32 %v9_v1, 0.0  ;;  %v410_v5 = vmax.f32 %v10_v2, 0.0  ;;  %v11_v6 = vld [vmem:[%s4023_s0 + $0x18] sm:$0x7f] }
   0x3   :  { %v411_v7 = vmax.f32 %v11_v6, 0.0  ;;  %v12_v8 = vld [vmem:[%s4023_s0 + $0x20] sm:$0x7f]  ;;  %v13_v9 = vld [vmem:[%s4023_s0 + $0x28] sm:$0x7f] }
   0x4   :  { %809 = vst.msk [vmem:[%s4024_s1] sm:$0x7f] %vm808_vm0, %v408_v3  ;;  %810 = vst.msk [vmem:[%s4024_s1 + $0x8] sm:$0x7f] %vm808_vm0, %v409_v4  ;;  %v412_v10 = vmax.f32 %v12_v8, 0.0  ;;  %v413_v11 = vmax.f32 %v13_v9, 0.0 }
   0x5   :  { %811 = vst.msk [vmem:[%s4024_s1 + $0x10] sm:$0x7f] %vm808_vm0, %v410_v5  ;;  %v14_v12 = vld [vmem:[%s4023_s0 + $0x30] sm:$0x7f]  ;;  %v15_v13 = vld [vmem:[%s4023_s0 + $0x38] sm:$0x7f] }
   0x6   :  { %812 = vst.msk [vmem:[%s4024_s1 + $0x18] sm:$0x7f] %vm808_vm0, %v411_v7  ;;  %v414_v14 = vmax.f32 %v14_v12, 0.0  ;;  %v415_v15 = vmax.f32 %v15_v13, 0.0  ;;  %v16_v16 = vld [vmem:[%s4023_s0 + $0x40] sm:$0x7f] }
   0x7   :  { %v17_v17 = vld [vmem:[%s4023_s0 + $0x48] sm:$0x7f]  ;;  %813 = vst.msk [vmem:[%s4024_s1 + $0x20] sm:$0x7f] %vm808_vm0, %v412_v10  ;;  %814 = vst.msk [vmem:[%s4024_s1 + $0x28] sm:$0x7f] %vm808_vm0, %v413_v11 }
   0x8   :  { %v416_v18 = vmax.f32 %v16_v16, 0.0  ;;  %v417_v19 = vmax.f32 %v17_v17, 0.0  ;;  %v18_v20 = vld [vmem:[%s4023_s0 + $0x50] sm:$0x7f]  ;;  %v19_v21 = vld [vmem:[%s4023_s0 + $0x58] sm:$0x7f] }
   0x9   :  { %815 = vst.msk [vmem:[%s4024_s1 + $0x30] sm:$0x7f] %vm808_vm0, %v414_v14  ;;  %816 = vst.msk [vmem:[%s4024_s1 + $0x38] sm:$0x7f] %vm808_vm0, %v415_v15  ;;  %v418_v22 = vmax.f32 %v18_v20, 0.0  ;;  %v419_v23 = vmax.f32 %v19_v21, 0.0 }
   0xa   :  { %v20_v24 = vld [vmem:[%s4023_s0 + $0x60] sm:$0x7f]  ;;  %v21_v25 = vld [vmem:[%s4023_s0 + $0x68] sm:$0x7f]  ;;  %817 = vst.msk [vmem:[%s4024_s1 + $0x40] sm:$0x7f] %vm808_vm0, %v416_v18 }
   0xb   :  { %818 = vst.msk [vmem:[%s4024_s1 + $0x48] sm:$0x7f] %vm808_vm0, %v417_v19  ;;  %v420_v26 = vmax.f32 %v20_v24, 0.0  ;;  %v421_v27 = vmax.f32 %v21_v25, 0.0  ;;  %v22_v28 = vld [vmem:[%s4023_s0 + $0x70] sm:$0x7f] }
   0xc   :  { %v23_v29 = vld [vmem:[%s4023_s0 + $0x78] sm:$0x7f]  ;;  %819 = vst.msk [vmem:[%s4024_s1 + $0x50] sm:$0x7f] %vm808_vm0, %v418_v22  ;;  %820 = vst.msk [vmem:[%s4024_s1 + $0x58] sm:$0x7f] %vm808_vm0, %v419_v23 }
   0xd   :  { %v422_v30 = vmax.f32 %v22_v28, 0.0  ;;  %v423_v31 = vmax.f32 %v23_v29, 0.0  ;;  %v24_v32 = vld [vmem:[%s4023_s0 + $0x80] sm:$0x7f]  ;;  %v25_v33 = vld [vmem:[%s4023_s0 + $0x88] sm:$0x7f] }
   0xe   :  { %821 = vst.msk [vmem:[%s4024_s1 + $0x60] sm:$0x7f] %vm808_vm0, %v420_v26  ;;  %822 = vst.msk [vmem:[%s4024_s1 + $0x68] sm:$0x7f] %vm808_vm0, %v421_v27  ;;  %v424_v34 = vmax.f32 %v24_v32, 0.0  ;;  %v425_v35 = vmax.f32 %v25_v33, 0.0 }
   0xf   :  { %v26_v36 = vld [vmem:[%s4023_s0 + $0x90] sm:$0x7f]  ;;  %v27_v37 = vld [vmem:[%s4023_s0 + $0x98] sm:$0x7f]  ;;  %823 = vst.msk [vmem:[%s4024_s1 + $0x70] sm:$0x7f] %vm808_vm0, %v422_v30 }
  0x10   :  { %824 = vst.msk [vmem:[%s4024_s1 + $0x78] sm:$0x7f] %vm808_vm0, %v423_v31  ;;  %v426_v38 = vmax.f32 %v26_v36, 0.0  ;;  %v427_v39 = vmax.f32 %v27_v37, 0.0  ;;  %v28_v40 = vld [vmem:[%s4023_s0 + $0xa0] sm:$0x7f] }
  0x11   :  { %v29_v41 = vld [vmem:[%s4023_s0 + $0xa8] sm:$0x7f]  ;;  %825 = vst.msk [vmem:[%s4024_s1 + $0x80] sm:$0x7f] %vm808_vm0, %v424_v34  ;;  %826 = vst.msk [vmem:[%s4024_s1 + $0x88] sm:$0x7f] %vm808_vm0, %v425_v35 }
  0x12   :  { %v428_v42 = vmax.f32 %v28_v40, 0.0  ;;  %v429_v43 = vmax.f32 %v29_v41, 0.0  ;;  %v30_v44 = vld [vmem:[%s4023_s0 + $0xb0] sm:$0x7f]  ;;  %v31_v45 = vld [vmem:[%s4023_s0 + $0xb8] sm:$0x7f] }
  0x13   :  { %827 = vst.msk [vmem:[%s4024_s1 + $0x90] sm:$0x7f] %vm808_vm0, %v426_v38  ;;  %828 = vst.msk [vmem:[%s4024_s1 + $0x98] sm:$0x7f] %vm808_vm0, %v427_v39  ;;  %v430_v46 = vmax.f32 %v30_v44, 0.0  ;;  %v431_v47 = vmax.f32 %v31_v45, 0.0 }
  0x14   :  { %v32_v48 = vld [vmem:[%s4023_s0 + $0xc0] sm:$0x7f]  ;;  %v33_v49 = vld [vmem:[%s4023_s0 + $0xc8] sm:$0x7f]  ;;  %829 = vst.msk [vmem:[%s4024_s1 + $0xa0] sm:$0x7f] %vm808_vm0, %v428_v42 }
  0x15   :  { %830 = vst.msk [vmem:[%s4024_s1 + $0xa8] sm:$0x7f] %vm808_vm0, %v429_v43  ;;  %v432_v50 = vmax.f32 %v32_v48, 0.0  ;;  %v433_v51 = vmax.f32 %v33_v49, 0.0  ;;  %v34_v52 = vld [vmem:[%s4023_s0 + $0xd0] sm:$0x7f] }
  0x16   :  { %v35_v53 = vld [vmem:[%s4023_s0 + $0xd8] sm:$0x7f]  ;;  %831 = vst.msk [vmem:[%s4024_s1 + $0xb0] sm:$0x7f] %vm808_vm0, %v430_v46  ;;  %832 = vst.msk [vmem:[%s4024_s1 + $0xb8] sm:$0x7f] %vm808_vm0, %v431_v47 }
  0x17   :  { %v434_v54 = vmax.f32 %v34_v52, 0.0  ;;  %v435_v55 = vmax.f32 %v35_v53, 0.0  ;;  %v36_v56 = vld [vmem:[%s4023_s0 + $0xe0] sm:$0x7f]  ;;  %v37_v57 = vld [vmem:[%s4023_s0 + $0xe8] sm:$0x7f] }
  0x18   :  { %833 = vst.msk [vmem:[%s4024_s1 + $0xc0] sm:$0x7f] %vm808_vm0, %v432_v50  ;;  %834 = vst.msk [vmem:[%s4024_s1 + $0xc8] sm:$0x7f] %vm808_vm0, %v433_v51  ;;  %v436_v58 = vmax.f32 %v36_v56, 0.0  ;;  %v437_v59 = vmax.f32 %v37_v57, 0.0 }
  0x19   :  { %v38_v60 = vld [vmem:[%s4023_s0 + $0xf0] sm:$0x7f]  ;;  %v39_v61 = vld [vmem:[%s4023_s0 + $0xf8] sm:$0x7f]  ;;  %835 = vst.msk [vmem:[%s4024_s1 + $0xd0] sm:$0x7f] %vm808_vm0, %v434_v54 }
  0x1a   :  { %836 = vst.msk [vmem:[%s4024_s1 + $0xd8] sm:$0x7f] %vm808_vm0, %v435_v55  ;;  %v438_v62 = vmax.f32 %v38_v60, 0.0  ;;  %v439_v63 = vmax.f32 %v39_v61, 0.0  ;;  %v40_v0 = vld [vmem:[%s4023_s0 + $0x100] sm:$0x7f] }
  0x1b   :  { %v41_v1 = vld [vmem:[%s4023_s0 + $0x108] sm:$0x7f]  ;;  %837 = vst.msk [vmem:[%s4024_s1 + $0xe0] sm:$0x7f] %vm808_vm0, %v436_v58  ;;  %838 = vst.msk [vmem:[%s4024_s1 + $0xe8] sm:$0x7f] %vm808_vm0, %v437_v59 }
  0x1c   :  { %v440_v2 = vmax.f32 %v40_v0, 0.0  ;;  %v441_v3 = vmax.f32 %v41_v1, 0.0  ;;  %v42_v4 = vld [vmem:[%s4023_s0 + $0x110] sm:$0x7f]  ;;  %v43_v5 = vld [vmem:[%s4023_s0 + $0x118] sm:$0x7f] }
  0x1d   :  { %839 = vst.msk [vmem:[%s4024_s1 + $0xf0] sm:$0x7f] %vm808_vm0, %v438_v62  ;;  %840 = vst.msk [vmem:[%s4024_s1 + $0xf8] sm:$0x7f] %vm808_vm0, %v439_v63  ;;  %v442_v6 = vmax.f32 %v42_v4, 0.0  ;;  %v443_v7 = vmax.f32 %v43_v5, 0.0 }
  0x1e   :  { %v44_v8 = vld [vmem:[%s4023_s0 + $0x120] sm:$0x7f]  ;;  %v45_v9 = vld [vmem:[%s4023_s0 + $0x128] sm:$0x7f]  ;;  %841 = vst.msk [vmem:[%s4024_s1 + $0x100] sm:$0x7f] %vm808_vm0, %v440_v2 }
  0x1f   :  { %842 = vst.msk [vmem:[%s4024_s1 + $0x108] sm:$0x7f] %vm808_vm0, %v441_v3  ;;  %v444_v10 = vmax.f32 %v44_v8, 0.0  ;;  %v445_v11 = vmax.f32 %v45_v9, 0.0  ;;  %v46_v12 = vld [vmem:[%s4023_s0 + $0x130] sm:$0x7f] }
  0x20   :  { %v47_v13 = vld [vmem:[%s4023_s0 + $0x138] sm:$0x7f]  ;;  %843 = vst.msk [vmem:[%s4024_s1 + $0x110] sm:$0x7f] %vm808_vm0, %v442_v6  ;;  %844 = vst.msk [vmem:[%s4024_s1 + $0x118] sm:$0x7f] %vm808_vm0, %v443_v7 }
  0x21   :  { %v446_v14 = vmax.f32 %v46_v12, 0.0  ;;  %v447_v15 = vmax.f32 %v47_v13, 0.0  ;;  %v48_v16 = vld [vmem:[%s4023_s0 + $0x140] sm:$0x7f]  ;;  %v49_v17 = vld [vmem:[%s4023_s0 + $0x148] sm:$0x7f] }
  0x22   :  { %845 = vst.msk [vmem:[%s4024_s1 + $0x120] sm:$0x7f] %vm808_vm0, %v444_v10  ;;  %846 = vst.msk [vmem:[%s4024_s1 + $0x128] sm:$0x7f] %vm808_vm0, %v445_v11  ;;  %v448_v18 = vmax.f32 %v48_v16, 0.0  ;;  %v449_v19 = vmax.f32 %v49_v17, 0.0 }
  0x23   :  { %v50_v20 = vld [vmem:[%s4023_s0 + $0x150] sm:$0x7f]  ;;  %v51_v21 = vld [vmem:[%s4023_s0 + $0x158] sm:$0x7f]  ;;  %847 = vst.msk [vmem:[%s4024_s1 + $0x130] sm:$0x7f] %vm808_vm0, %v446_v14 }
  0x24   :  { %848 = vst.msk [vmem:[%s4024_s1 + $0x138] sm:$0x7f] %vm808_vm0, %v447_v15  ;;  %v450_v22 = vmax.f32 %v50_v20, 0.0  ;;  %v451_v23 = vmax.f32 %v51_v21, 0.0  ;;  %v52_v24 = vld [vmem:[%s4023_s0 + $0x160] sm:$0x7f] }
  0x25   :  { %v53_v25 = vld [vmem:[%s4023_s0 + $0x168] sm:$0x7f]  ;;  %849 = vst.msk [vmem:[%s4024_s1 + $0x140] sm:$0x7f] %vm808_vm0, %v448_v18  ;;  %850 = vst.msk [vmem:[%s4024_s1 + $0x148] sm:$0x7f] %vm808_vm0, %v449_v19 }
  0x26   :  { %v452_v26 = vmax.f32 %v52_v24, 0.0  ;;  %v453_v27 = vmax.f32 %v53_v25, 0.0  ;;  %v54_v28 = vld [vmem:[%s4023_s0 + $0x170] sm:$0x7f]  ;;  %v55_v29 = vld [vmem:[%s4023_s0 + $0x178] sm:$0x7f] }
  0x27   :  { %851 = vst.msk [vmem:[%s4024_s1 + $0x150] sm:$0x7f] %vm808_vm0, %v450_v22  ;;  %852 = vst.msk [vmem:[%s4024_s1 + $0x158] sm:$0x7f] %vm808_vm0, %v451_v23  ;;  %v454_v30 = vmax.f32 %v54_v28, 0.0  ;;  %v455_v31 = vmax.f32 %v55_v29, 0.0 }
  0x28   :  { %v56_v32 = vld [vmem:[%s4023_s0 + $0x180] sm:$0x7f]  ;;  %v57_v33 = vld [vmem:[%s4023_s0 + $0x188] sm:$0x7f]  ;;  %853 = vst.msk [vmem:[%s4024_s1 + $0x160] sm:$0x7f] %vm808_vm0, %v452_v26 }
  0x29   :  { %854 = vst.msk [vmem:[%s4024_s1 + $0x168] sm:$0x7f] %vm808_vm0, %v453_v27  ;;  %v456_v34 = vmax.f32 %v56_v32, 0.0  ;;  %v457_v35 = vmax.f32 %v57_v33, 0.0  ;;  %v58_v36 = vld [vmem:[%s4023_s0 + $0x190] sm:$0x7f] }
  0x2a   :  { %v59_v37 = vld [vmem:[%s4023_s0 + $0x198] sm:$0x7f]  ;;  %855 = vst.msk [vmem:[%s4024_s1 + $0x170] sm:$0x7f] %vm808_vm0, %v454_v30  ;;  %856 = vst.msk [vmem:[%s4024_s1 + $0x178] sm:$0x7f] %vm808_vm0, %v455_v31 }
  0x2b   :  { %v458_v38 = vmax.f32 %v58_v36, 0.0  ;;  %v459_v39 = vmax.f32 %v59_v37, 0.0  ;;  %v60_v40 = vld [vmem:[%s4023_s0 + $0x1a0] sm:$0x7f]  ;;  %v61_v41 = vld [vmem:[%s4023_s0 + $0x1a8] sm:$0x7f] }
  0x2c   :  { %857 = vst.msk [vmem:[%s4024_s1 + $0x180] sm:$0x7f] %vm808_vm0, %v456_v34  ;;  %858 = vst.msk [vmem:[%s4024_s1 + $0x188] sm:$0x7f] %vm808_vm0, %v457_v35  ;;  %v460_v42 = vmax.f32 %v60_v40, 0.0  ;;  %v461_v43 = vmax.f32 %v61_v41, 0.0 }
  0x2d   :  { %v62_v44 = vld [vmem:[%s4023_s0 + $0x1b0] sm:$0x7f]  ;;  %v63_v45 = vld [vmem:[%s4023_s0 + $0x1b8] sm:$0x7f]  ;;  %859 = vst.msk [vmem:[%s4024_s1 + $0x190] sm:$0x7f] %vm808_vm0, %v458_v38 }
  0x2e   :  { %860 = vst.msk [vmem:[%s4024_s1 + $0x198] sm:$0x7f] %vm808_vm0, %v459_v39  ;;  %v462_v46 = vmax.f32 %v62_v44, 0.0  ;;  %v463_v47 = vmax.f32 %v63_v45, 0.0  ;;  %v64_v48 = vld [vmem:[%s4023_s0 + $0x1c0] sm:$0x7f] }
  0x2f   :  { %v65_v49 = vld [vmem:[%s4023_s0 + $0x1c8] sm:$0x7f]  ;;  %861 = vst.msk [vmem:[%s4024_s1 + $0x1a0] sm:$0x7f] %vm808_vm0, %v460_v42  ;;  %862 = vst.msk [vmem:[%s4024_s1 + $0x1a8] sm:$0x7f] %vm808_vm0, %v461_v43 }
  0x30   :  { %v464_v50 = vmax.f32 %v64_v48, 0.0  ;;  %v465_v51 = vmax.f32 %v65_v49, 0.0  ;;  %v66_v52 = vld [vmem:[%s4023_s0 + $0x1d0] sm:$0x7f]  ;;  %v67_v53 = vld [vmem:[%s4023_s0 + $0x1d8] sm:$0x7f] }
  0x31   :  { %863 = vst.msk [vmem:[%s4024_s1 + $0x1b0] sm:$0x7f] %vm808_vm0, %v462_v46  ;;  %864 = vst.msk [vmem:[%s4024_s1 + $0x1b8] sm:$0x7f] %vm808_vm0, %v463_v47  ;;  %v466_v54 = vmax.f32 %v66_v52, 0.0  ;;  %v467_v55 = vmax.f32 %v67_v53, 0.0 }
  0x32   :  { %v68_v56 = vld [vmem:[%s4023_s0 + $0x1e0] sm:$0x7f]  ;;  %v69_v57 = vld [vmem:[%s4023_s0 + $0x1e8] sm:$0x7f]  ;;  %865 = vst.msk [vmem:[%s4024_s1 + $0x1c0] sm:$0x7f] %vm808_vm0, %v464_v50 }
  0x33   :  { %866 = vst.msk [vmem:[%s4024_s1 + $0x1c8] sm:$0x7f] %vm808_vm0, %v465_v51  ;;  %v468_v58 = vmax.f32 %v68_v56, 0.0  ;;  %v469_v59 = vmax.f32 %v69_v57, 0.0  ;;  %v70_v60 = vld [vmem:[%s4023_s0 + $0x1f0] sm:$0x7f] }
  0x34   :  { %v71_v61 = vld [vmem:[%s4023_s0 + $0x1f8] sm:$0x7f]  ;;  %867 = vst.msk [vmem:[%s4024_s1 + $0x1d0] sm:$0x7f] %vm808_vm0, %v466_v54  ;;  %868 = vst.msk [vmem:[%s4024_s1 + $0x1d8] sm:$0x7f] %vm808_vm0, %v467_v55 }
  0x35   :  { %v470_v62 = vmax.f32 %v70_v60, 0.0  ;;  %v471_v63 = vmax.f32 %v71_v61, 0.0  ;;  %v72_v0 = vld [vmem:[%s4023_s0 + $0x200] sm:$0x7f]  ;;  %v73_v1 = vld [vmem:[%s4023_s0 + $0x208] sm:$0x7f] }
  0x36   :  { %869 = vst.msk [vmem:[%s4024_s1 + $0x1e0] sm:$0x7f] %vm808_vm0, %v468_v58  ;;  %870 = vst.msk [vmem:[%s4024_s1 + $0x1e8] sm:$0x7f] %vm808_vm0, %v469_v59  ;;  %v472_v2 = vmax.f32 %v72_v0, 0.0  ;;  %v473_v3 = vmax.f32 %v73_v1, 0.0 }
  0x37   :  { %v74_v4 = vld [vmem:[%s4023_s0 + $0x210] sm:$0x7f]  ;;  %v75_v5 = vld [vmem:[%s4023_s0 + $0x218] sm:$0x7f]  ;;  %871 = vst.msk [vmem:[%s4024_s1 + $0x1f0] sm:$0x7f] %vm808_vm0, %v470_v62 }
  0x38   :  { %872 = vst.msk [vmem:[%s4024_s1 + $0x1f8] sm:$0x7f] %vm808_vm0, %v471_v63  ;;  %v474_v6 = vmax.f32 %v74_v4, 0.0  ;;  %v475_v7 = vmax.f32 %v75_v5, 0.0  ;;  %v76_v8 = vld [vmem:[%s4023_s0 + $0x220] sm:$0x7f] }
  0x39   :  { %v77_v9 = vld [vmem:[%s4023_s0 + $0x228] sm:$0x7f]  ;;  %873 = vst.msk [vmem:[%s4024_s1 + $0x200] sm:$0x7f] %vm808_vm0, %v472_v2  ;;  %874 = vst.msk [vmem:[%s4024_s1 + $0x208] sm:$0x7f] %vm808_vm0, %v473_v3 }
  0x3a   :  { %v476_v10 = vmax.f32 %v76_v8, 0.0  ;;  %v477_v11 = vmax.f32 %v77_v9, 0.0  ;;  %v78_v12 = vld [vmem:[%s4023_s0 + $0x230] sm:$0x7f]  ;;  %v79_v13 = vld [vmem:[%s4023_s0 + $0x238] sm:$0x7f] }
  0x3b   :  { %875 = vst.msk [vmem:[%s4024_s1 + $0x210] sm:$0x7f] %vm808_vm0, %v474_v6  ;;  %876 = vst.msk [vmem:[%s4024_s1 + $0x218] sm:$0x7f] %vm808_vm0, %v475_v7  ;;  %v478_v14 = vmax.f32 %v78_v12, 0.0  ;;  %v479_v15 = vmax.f32 %v79_v13, 0.0 }
  0x3c   :  { %v80_v16 = vld [vmem:[%s4023_s0 + $0x240] sm:$0x7f]  ;;  %v81_v17 = vld [vmem:[%s4023_s0 + $0x248] sm:$0x7f]  ;;  %877 = vst.msk [vmem:[%s4024_s1 + $0x220] sm:$0x7f] %vm808_vm0, %v476_v10 }
  0x3d   :  { %878 = vst.msk [vmem:[%s4024_s1 + $0x228] sm:$0x7f] %vm808_vm0, %v477_v11  ;;  %v480_v18 = vmax.f32 %v80_v16, 0.0  ;;  %v481_v19 = vmax.f32 %v81_v17, 0.0  ;;  %v82_v20 = vld [vmem:[%s4023_s0 + $0x250] sm:$0x7f] }
  0x3e   :  { %v83_v21 = vld [vmem:[%s4023_s0 + $0x258] sm:$0x7f]  ;;  %879 = vst.msk [vmem:[%s4024_s1 + $0x230] sm:$0x7f] %vm808_vm0, %v478_v14  ;;  %880 = vst.msk [vmem:[%s4024_s1 + $0x238] sm:$0x7f] %vm808_vm0, %v479_v15 }
  0x3f   :  { %v482_v22 = vmax.f32 %v82_v20, 0.0  ;;  %v483_v23 = vmax.f32 %v83_v21, 0.0  ;;  %v84_v24 = vld [vmem:[%s4023_s0 + $0x260] sm:$0x7f]  ;;  %v85_v25 = vld [vmem:[%s4023_s0 + $0x268] sm:$0x7f] }
  0x40   :  { %881 = vst.msk [vmem:[%s4024_s1 + $0x240] sm:$0x7f] %vm808_vm0, %v480_v18  ;;  %882 = vst.msk [vmem:[%s4024_s1 + $0x248] sm:$0x7f] %vm808_vm0, %v481_v19  ;;  %v484_v26 = vmax.f32 %v84_v24, 0.0  ;;  %v485_v27 = vmax.f32 %v85_v25, 0.0 }
  0x41   :  { %v86_v28 = vld [vmem:[%s4023_s0 + $0x270] sm:$0x7f]  ;;  %v87_v29 = vld [vmem:[%s4023_s0 + $0x278] sm:$0x7f]  ;;  %883 = vst.msk [vmem:[%s4024_s1 + $0x250] sm:$0x7f] %vm808_vm0, %v482_v22 }
  0x42   :  { %884 = vst.msk [vmem:[%s4024_s1 + $0x258] sm:$0x7f] %vm808_vm0, %v483_v23  ;;  %v486_v30 = vmax.f32 %v86_v28, 0.0  ;;  %v487_v31 = vmax.f32 %v87_v29, 0.0  ;;  %v88_v32 = vld [vmem:[%s4023_s0 + $0x280] sm:$0x7f] }
  0x43   :  { %v89_v33 = vld [vmem:[%s4023_s0 + $0x288] sm:$0x7f]  ;;  %885 = vst.msk [vmem:[%s4024_s1 + $0x260] sm:$0x7f] %vm808_vm0, %v484_v26  ;;  %886 = vst.msk [vmem:[%s4024_s1 + $0x268] sm:$0x7f] %vm808_vm0, %v485_v27 }
  0x44   :  { %v488_v34 = vmax.f32 %v88_v32, 0.0  ;;  %v489_v35 = vmax.f32 %v89_v33, 0.0  ;;  %v90_v36 = vld [vmem:[%s4023_s0 + $0x290] sm:$0x7f]  ;;  %v91_v37 = vld [vmem:[%s4023_s0 + $0x298] sm:$0x7f] }
  0x45   :  { %887 = vst.msk [vmem:[%s4024_s1 + $0x270] sm:$0x7f] %vm808_vm0, %v486_v30  ;;  %888 = vst.msk [vmem:[%s4024_s1 + $0x278] sm:$0x7f] %vm808_vm0, %v487_v31  ;;  %v490_v38 = vmax.f32 %v90_v36, 0.0  ;;  %v491_v39 = vmax.f32 %v91_v37, 0.0 }
  0x46   :  { %v92_v40 = vld [vmem:[%s4023_s0 + $0x2a0] sm:$0x7f]  ;;  %v93_v41 = vld [vmem:[%s4023_s0 + $0x2a8] sm:$0x7f]  ;;  %889 = vst.msk [vmem:[%s4024_s1 + $0x280] sm:$0x7f] %vm808_vm0, %v488_v34 }
  0x47   :  { %890 = vst.msk [vmem:[%s4024_s1 + $0x288] sm:$0x7f] %vm808_vm0, %v489_v35  ;;  %v492_v42 = vmax.f32 %v92_v40, 0.0  ;;  %v493_v43 = vmax.f32 %v93_v41, 0.0  ;;  %v94_v44 = vld [vmem:[%s4023_s0 + $0x2b0] sm:$0x7f] }
  0x48   :  { %v95_v45 = vld [vmem:[%s4023_s0 + $0x2b8] sm:$0x7f]  ;;  %891 = vst.msk [vmem:[%s4024_s1 + $0x290] sm:$0x7f] %vm808_vm0, %v490_v38  ;;  %892 = vst.msk [vmem:[%s4024_s1 + $0x298] sm:$0x7f] %vm808_vm0, %v491_v39 }
  0x49   :  { %v494_v46 = vmax.f32 %v94_v44, 0.0  ;;  %v495_v47 = vmax.f32 %v95_v45, 0.0  ;;  %v96_v48 = vld [vmem:[%s4023_s0 + $0x2c0] sm:$0x7f]  ;;  %v97_v49 = vld [vmem:[%s4023_s0 + $0x2c8] sm:$0x7f] }
  0x4a   :  { %893 = vst.msk [vmem:[%s4024_s1 + $0x2a0] sm:$0x7f] %vm808_vm0, %v492_v42  ;;  %894 = vst.msk [vmem:[%s4024_s1 + $0x2a8] sm:$0x7f] %vm808_vm0, %v493_v43  ;;  %v496_v50 = vmax.f32 %v96_v48, 0.0  ;;  %v497_v51 = vmax.f32 %v97_v49, 0.0 }
  0x4b   :  { %v98_v52 = vld [vmem:[%s4023_s0 + $0x2d0] sm:$0x7f]  ;;  %v99_v53 = vld [vmem:[%s4023_s0 + $0x2d8] sm:$0x7f]  ;;  %895 = vst.msk [vmem:[%s4024_s1 + $0x2b0] sm:$0x7f] %vm808_vm0, %v494_v46 }
  0x4c   :  { %896 = vst.msk [vmem:[%s4024_s1 + $0x2b8] sm:$0x7f] %vm808_vm0, %v495_v47  ;;  %v498_v54 = vmax.f32 %v98_v52, 0.0  ;;  %v499_v55 = vmax.f32 %v99_v53, 0.0  ;;  %v100_v56 = vld [vmem:[%s4023_s0 + $0x2e0] sm:$0x7f] }
  0x4d   :  { %v101_v57 = vld [vmem:[%s4023_s0 + $0x2e8] sm:$0x7f]  ;;  %897 = vst.msk [vmem:[%s4024_s1 + $0x2c0] sm:$0x7f] %vm808_vm0, %v496_v50  ;;  %898 = vst.msk [vmem:[%s4024_s1 + $0x2c8] sm:$0x7f] %vm808_vm0, %v497_v51 }
  0x4e   :  { %v500_v58 = vmax.f32 %v100_v56, 0.0  ;;  %v501_v59 = vmax.f32 %v101_v57, 0.0  ;;  %v102_v60 = vld [vmem:[%s4023_s0 + $0x2f0] sm:$0x7f]  ;;  %v103_v61 = vld [vmem:[%s4023_s0 + $0x2f8] sm:$0x7f] }
  0x4f   :  { %899 = vst.msk [vmem:[%s4024_s1 + $0x2d0] sm:$0x7f] %vm808_vm0, %v498_v54  ;;  %900 = vst.msk [vmem:[%s4024_s1 + $0x2d8] sm:$0x7f] %vm808_vm0, %v499_v55  ;;  %v502_v62 = vmax.f32 %v102_v60, 0.0  ;;  %v503_v63 = vmax.f32 %v103_v61, 0.0 }
  0x50   :  { %v104_v0 = vld [vmem:[%s4023_s0 + $0x300] sm:$0x7f]  ;;  %v105_v1 = vld [vmem:[%s4023_s0 + $0x308] sm:$0x7f]  ;;  %901 = vst.msk [vmem:[%s4024_s1 + $0x2e0] sm:$0x7f] %vm808_vm0, %v500_v58 }
  0x51   :  { %902 = vst.msk [vmem:[%s4024_s1 + $0x2e8] sm:$0x7f] %vm808_vm0, %v501_v59  ;;  %v504_v2 = vmax.f32 %v104_v0, 0.0  ;;  %v505_v3 = vmax.f32 %v105_v1, 0.0  ;;  %v106_v4 = vld [vmem:[%s4023_s0 + $0x310] sm:$0x7f] }
  0x52   :  { %v107_v5 = vld [vmem:[%s4023_s0 + $0x318] sm:$0x7f]  ;;  %903 = vst.msk [vmem:[%s4024_s1 + $0x2f0] sm:$0x7f] %vm808_vm0, %v502_v62  ;;  %904 = vst.msk [vmem:[%s4024_s1 + $0x2f8] sm:$0x7f] %vm808_vm0, %v503_v63 }
  0x53   :  { %v506_v6 = vmax.f32 %v106_v4, 0.0  ;;  %v507_v7 = vmax.f32 %v107_v5, 0.0  ;;  %v108_v8 = vld [vmem:[%s4023_s0 + $0x320] sm:$0x7f]  ;;  %v109_v9 = vld [vmem:[%s4023_s0 + $0x328] sm:$0x7f] }
  0x54   :  { %905 = vst.msk [vmem:[%s4024_s1 + $0x300] sm:$0x7f] %vm808_vm0, %v504_v2  ;;  %906 = vst.msk [vmem:[%s4024_s1 + $0x308] sm:$0x7f] %vm808_vm0, %v505_v3  ;;  %v508_v10 = vmax.f32 %v108_v8, 0.0  ;;  %v509_v11 = vmax.f32 %v109_v9, 0.0 }
  0x55   :  { %v110_v12 = vld [vmem:[%s4023_s0 + $0x330] sm:$0x7f]  ;;  %v111_v13 = vld [vmem:[%s4023_s0 + $0x338] sm:$0x7f]  ;;  %907 = vst.msk [vmem:[%s4024_s1 + $0x310] sm:$0x7f] %vm808_vm0, %v506_v6 }
  0x56   :  { %908 = vst.msk [vmem:[%s4024_s1 + $0x318] sm:$0x7f] %vm808_vm0, %v507_v7  ;;  %v510_v14 = vmax.f32 %v110_v12, 0.0  ;;  %v511_v15 = vmax.f32 %v111_v13, 0.0  ;;  %v112_v16 = vld [vmem:[%s4023_s0 + $0x340] sm:$0x7f] }
  0x57   :  { %v113_v17 = vld [vmem:[%s4023_s0 + $0x348] sm:$0x7f]  ;;  %909 = vst.msk [vmem:[%s4024_s1 + $0x320] sm:$0x7f] %vm808_vm0, %v508_v10  ;;  %910 = vst.msk [vmem:[%s4024_s1 + $0x328] sm:$0x7f] %vm808_vm0, %v509_v11 }
  0x58   :  { %v512_v18 = vmax.f32 %v112_v16, 0.0  ;;  %v513_v19 = vmax.f32 %v113_v17, 0.0  ;;  %v114_v20 = vld [vmem:[%s4023_s0 + $0x350] sm:$0x7f]  ;;  %v115_v21 = vld [vmem:[%s4023_s0 + $0x358] sm:$0x7f] }
  0x59   :  { %911 = vst.msk [vmem:[%s4024_s1 + $0x330] sm:$0x7f] %vm808_vm0, %v510_v14  ;;  %912 = vst.msk [vmem:[%s4024_s1 + $0x338] sm:$0x7f] %vm808_vm0, %v511_v15  ;;  %v514_v22 = vmax.f32 %v114_v20, 0.0  ;;  %v515_v23 = vmax.f32 %v115_v21, 0.0 }
  0x5a   :  { %v116_v24 = vld [vmem:[%s4023_s0 + $0x360] sm:$0x7f]  ;;  %v117_v25 = vld [vmem:[%s4023_s0 + $0x368] sm:$0x7f]  ;;  %913 = vst.msk [vmem:[%s4024_s1 + $0x340] sm:$0x7f] %vm808_vm0, %v512_v18 }
  0x5b   :  { %914 = vst.msk [vmem:[%s4024_s1 + $0x348] sm:$0x7f] %vm808_vm0, %v513_v19  ;;  %v516_v26 = vmax.f32 %v116_v24, 0.0  ;;  %v517_v27 = vmax.f32 %v117_v25, 0.0  ;;  %v118_v28 = vld [vmem:[%s4023_s0 + $0x370] sm:$0x7f] }
  0x5c   :  { %v119_v29 = vld [vmem:[%s4023_s0 + $0x378] sm:$0x7f]  ;;  %915 = vst.msk [vmem:[%s4024_s1 + $0x350] sm:$0x7f] %vm808_vm0, %v514_v22  ;;  %916 = vst.msk [vmem:[%s4024_s1 + $0x358] sm:$0x7f] %vm808_vm0, %v515_v23 }
  0x5d   :  { %v518_v30 = vmax.f32 %v118_v28, 0.0  ;;  %v519_v31 = vmax.f32 %v119_v29, 0.0  ;;  %v120_v32 = vld [vmem:[%s4023_s0 + $0x380] sm:$0x7f]  ;;  %v121_v33 = vld [vmem:[%s4023_s0 + $0x388] sm:$0x7f] }
  0x5e   :  { %917 = vst.msk [vmem:[%s4024_s1 + $0x360] sm:$0x7f] %vm808_vm0, %v516_v26  ;;  %918 = vst.msk [vmem:[%s4024_s1 + $0x368] sm:$0x7f] %vm808_vm0, %v517_v27  ;;  %v520_v34 = vmax.f32 %v120_v32, 0.0  ;;  %v521_v35 = vmax.f32 %v121_v33, 0.0 }
  0x5f   :  { %v122_v36 = vld [vmem:[%s4023_s0 + $0x390] sm:$0x7f]  ;;  %v123_v37 = vld [vmem:[%s4023_s0 + $0x398] sm:$0x7f]  ;;  %919 = vst.msk [vmem:[%s4024_s1 + $0x370] sm:$0x7f] %vm808_vm0, %v518_v30 }
  0x60   :  { %920 = vst.msk [vmem:[%s4024_s1 + $0x378] sm:$0x7f] %vm808_vm0, %v519_v31  ;;  %v522_v38 = vmax.f32 %v122_v36, 0.0  ;;  %v523_v39 = vmax.f32 %v123_v37, 0.0  ;;  %v124_v40 = vld [vmem:[%s4023_s0 + $0x3a0] sm:$0x7f] }
  0x61   :  { %v125_v41 = vld [vmem:[%s4023_s0 + $0x3a8] sm:$0x7f]  ;;  %921 = vst.msk [vmem:[%s4024_s1 + $0x380] sm:$0x7f] %vm808_vm0, %v520_v34  ;;  %922 = vst.msk [vmem:[%s4024_s1 + $0x388] sm:$0x7f] %vm808_vm0, %v521_v35 }
  0x62   :  { %v524_v42 = vmax.f32 %v124_v40, 0.0  ;;  %v525_v43 = vmax.f32 %v125_v41, 0.0  ;;  %v126_v44 = vld [vmem:[%s4023_s0 + $0x3b0] sm:$0x7f]  ;;  %v127_v45 = vld [vmem:[%s4023_s0 + $0x3b8] sm:$0x7f] }
  0x63   :  { %923 = vst.msk [vmem:[%s4024_s1 + $0x390] sm:$0x7f] %vm808_vm0, %v522_v38  ;;  %924 = vst.msk [vmem:[%s4024_s1 + $0x398] sm:$0x7f] %vm808_vm0, %v523_v39  ;;  %v526_v46 = vmax.f32 %v126_v44, 0.0  ;;  %v527_v47 = vmax.f32 %v127_v45, 0.0 }
  0x64   :  { %v128_v48 = vld [vmem:[%s4023_s0 + $0x3c0] sm:$0x7f]  ;;  %v129_v49 = vld [vmem:[%s4023_s0 + $0x3c8] sm:$0x7f]  ;;  %925 = vst.msk [vmem:[%s4024_s1 + $0x3a0] sm:$0x7f] %vm808_vm0, %v524_v42 }
  0x65   :  { %926 = vst.msk [vmem:[%s4024_s1 + $0x3a8] sm:$0x7f] %vm808_vm0, %v525_v43  ;;  %v528_v50 = vmax.f32 %v128_v48, 0.0  ;;  %v529_v51 = vmax.f32 %v129_v49, 0.0  ;;  %v130_v52 = vld [vmem:[%s4023_s0 + $0x3d0] sm:$0x7f] }
  0x66   :  { %v131_v53 = vld [vmem:[%s4023_s0 + $0x3d8] sm:$0x7f]  ;;  %927 = vst.msk [vmem:[%s4024_s1 + $0x3b0] sm:$0x7f] %vm808_vm0, %v526_v46  ;;  %928 = vst.msk [vmem:[%s4024_s1 + $0x3b8] sm:$0x7f] %vm808_vm0, %v527_v47 }
  0x67   :  { %v530_v54 = vmax.f32 %v130_v52, 0.0  ;;  %v531_v55 = vmax.f32 %v131_v53, 0.0  ;;  %v132_v56 = vld [vmem:[%s4023_s0 + $0x3e0] sm:$0x7f]  ;;  %v133_v57 = vld [vmem:[%s4023_s0 + $0x3e8] sm:$0x7f] }
  0x68   :  { %929 = vst.msk [vmem:[%s4024_s1 + $0x3c0] sm:$0x7f] %vm808_vm0, %v528_v50  ;;  %930 = vst.msk [vmem:[%s4024_s1 + $0x3c8] sm:$0x7f] %vm808_vm0, %v529_v51  ;;  %v532_v58 = vmax.f32 %v132_v56, 0.0  ;;  %v533_v59 = vmax.f32 %v133_v57, 0.0 }
  0x69   :  { %v134_v60 = vld [vmem:[%s4023_s0 + $0x3f0] sm:$0x7f]  ;;  %v135_v61 = vld [vmem:[%s4023_s0 + $0x3f8] sm:$0x7f]  ;;  %931 = vst.msk [vmem:[%s4024_s1 + $0x3d0] sm:$0x7f] %vm808_vm0, %v530_v54 }
  0x6a   :  { %932 = vst.msk [vmem:[%s4024_s1 + $0x3d8] sm:$0x7f] %vm808_vm0, %v531_v55  ;;  %v534_v62 = vmax.f32 %v134_v60, 0.0  ;;  %v535_v63 = vmax.f32 %v135_v61, 0.0  ;;  %v136_v0 = vld [vmem:[%s4023_s0 + $0x400] sm:$0x7f] }
  0x6b   :  { %v137_v1 = vld [vmem:[%s4023_s0 + $0x408] sm:$0x7f]  ;;  %933 = vst.msk [vmem:[%s4024_s1 + $0x3e0] sm:$0x7f] %vm808_vm0, %v532_v58  ;;  %934 = vst.msk [vmem:[%s4024_s1 + $0x3e8] sm:$0x7f] %vm808_vm0, %v533_v59 }
  0x6c   :  { %v536_v2 = vmax.f32 %v136_v0, 0.0  ;;  %v537_v3 = vmax.f32 %v137_v1, 0.0  ;;  %v138_v4 = vld [vmem:[%s4023_s0 + $0x410] sm:$0x7f]  ;;  %v139_v5 = vld [vmem:[%s4023_s0 + $0x418] sm:$0x7f] }
  0x6d   :  { %935 = vst.msk [vmem:[%s4024_s1 + $0x3f0] sm:$0x7f] %vm808_vm0, %v534_v62  ;;  %936 = vst.msk [vmem:[%s4024_s1 + $0x3f8] sm:$0x7f] %vm808_vm0, %v535_v63  ;;  %v538_v6 = vmax.f32 %v138_v4, 0.0  ;;  %v539_v7 = vmax.f32 %v139_v5, 0.0 }
  0x6e   :  { %v140_v8 = vld [vmem:[%s4023_s0 + $0x420] sm:$0x7f]  ;;  %v141_v9 = vld [vmem:[%s4023_s0 + $0x428] sm:$0x7f]  ;;  %937 = vst.msk [vmem:[%s4024_s1 + $0x400] sm:$0x7f] %vm808_vm0, %v536_v2 }
  0x6f   :  { %938 = vst.msk [vmem:[%s4024_s1 + $0x408] sm:$0x7f] %vm808_vm0, %v537_v3  ;;  %v540_v10 = vmax.f32 %v140_v8, 0.0  ;;  %v541_v11 = vmax.f32 %v141_v9, 0.0  ;;  %v142_v12 = vld [vmem:[%s4023_s0 + $0x430] sm:$0x7f] }
  0x70   :  { %v143_v13 = vld [vmem:[%s4023_s0 + $0x438] sm:$0x7f]  ;;  %939 = vst.msk [vmem:[%s4024_s1 + $0x410] sm:$0x7f] %vm808_vm0, %v538_v6  ;;  %940 = vst.msk [vmem:[%s4024_s1 + $0x418] sm:$0x7f] %vm808_vm0, %v539_v7 }
  0x71   :  { %v542_v14 = vmax.f32 %v142_v12, 0.0  ;;  %v543_v15 = vmax.f32 %v143_v13, 0.0  ;;  %v144_v16 = vld [vmem:[%s4023_s0 + $0x440] sm:$0x7f]  ;;  %v145_v17 = vld [vmem:[%s4023_s0 + $0x448] sm:$0x7f] }
  0x72   :  { %941 = vst.msk [vmem:[%s4024_s1 + $0x420] sm:$0x7f] %vm808_vm0, %v540_v10  ;;  %942 = vst.msk [vmem:[%s4024_s1 + $0x428] sm:$0x7f] %vm808_vm0, %v541_v11  ;;  %v544_v18 = vmax.f32 %v144_v16, 0.0  ;;  %v545_v19 = vmax.f32 %v145_v17, 0.0 }
  0x73   :  { %v146_v20 = vld [vmem:[%s4023_s0 + $0x450] sm:$0x7f]  ;;  %v147_v21 = vld [vmem:[%s4023_s0 + $0x458] sm:$0x7f]  ;;  %943 = vst.msk [vmem:[%s4024_s1 + $0x430] sm:$0x7f] %vm808_vm0, %v542_v14 }
  0x74   :  { %944 = vst.msk [vmem:[%s4024_s1 + $0x438] sm:$0x7f] %vm808_vm0, %v543_v15  ;;  %v546_v22 = vmax.f32 %v146_v20, 0.0  ;;  %v547_v23 = vmax.f32 %v147_v21, 0.0  ;;  %v148_v24 = vld [vmem:[%s4023_s0 + $0x460] sm:$0x7f] }
  0x75   :  { %v149_v25 = vld [vmem:[%s4023_s0 + $0x468] sm:$0x7f]  ;;  %945 = vst.msk [vmem:[%s4024_s1 + $0x440] sm:$0x7f] %vm808_vm0, %v544_v18  ;;  %946 = vst.msk [vmem:[%s4024_s1 + $0x448] sm:$0x7f] %vm808_vm0, %v545_v19 }
  0x76   :  { %v548_v26 = vmax.f32 %v148_v24, 0.0  ;;  %v549_v27 = vmax.f32 %v149_v25, 0.0  ;;  %v150_v28 = vld [vmem:[%s4023_s0 + $0x470] sm:$0x7f]  ;;  %v151_v29 = vld [vmem:[%s4023_s0 + $0x478] sm:$0x7f] }
  0x77   :  { %947 = vst.msk [vmem:[%s4024_s1 + $0x450] sm:$0x7f] %vm808_vm0, %v546_v22  ;;  %948 = vst.msk [vmem:[%s4024_s1 + $0x458] sm:$0x7f] %vm808_vm0, %v547_v23  ;;  %v550_v30 = vmax.f32 %v150_v28, 0.0  ;;  %v551_v31 = vmax.f32 %v151_v29, 0.0 }
  0x78   :  { %v152_v32 = vld [vmem:[%s4023_s0 + $0x480] sm:$0x7f]  ;;  %v153_v33 = vld [vmem:[%s4023_s0 + $0x488] sm:$0x7f]  ;;  %949 = vst.msk [vmem:[%s4024_s1 + $0x460] sm:$0x7f] %vm808_vm0, %v548_v26 }
  0x79   :  { %950 = vst.msk [vmem:[%s4024_s1 + $0x468] sm:$0x7f] %vm808_vm0, %v549_v27  ;;  %v552_v34 = vmax.f32 %v152_v32, 0.0  ;;  %v553_v35 = vmax.f32 %v153_v33, 0.0  ;;  %v154_v36 = vld [vmem:[%s4023_s0 + $0x490] sm:$0x7f] }
  0x7a   :  { %v155_v37 = vld [vmem:[%s4023_s0 + $0x498] sm:$0x7f]  ;;  %951 = vst.msk [vmem:[%s4024_s1 + $0x470] sm:$0x7f] %vm808_vm0, %v550_v30  ;;  %952 = vst.msk [vmem:[%s4024_s1 + $0x478] sm:$0x7f] %vm808_vm0, %v551_v31 }
  0x7b   :  { %v554_v38 = vmax.f32 %v154_v36, 0.0  ;;  %v555_v39 = vmax.f32 %v155_v37, 0.0  ;;  %v156_v40 = vld [vmem:[%s4023_s0 + $0x4a0] sm:$0x7f]  ;;  %v157_v41 = vld [vmem:[%s4023_s0 + $0x4a8] sm:$0x7f] }
  0x7c   :  { %953 = vst.msk [vmem:[%s4024_s1 + $0x480] sm:$0x7f] %vm808_vm0, %v552_v34  ;;  %954 = vst.msk [vmem:[%s4024_s1 + $0x488] sm:$0x7f] %vm808_vm0, %v553_v35  ;;  %v556_v42 = vmax.f32 %v156_v40, 0.0  ;;  %v557_v43 = vmax.f32 %v157_v41, 0.0 }
  0x7d   :  { %v158_v44 = vld [vmem:[%s4023_s0 + $0x4b0] sm:$0x7f]  ;;  %v159_v45 = vld [vmem:[%s4023_s0 + $0x4b8] sm:$0x7f]  ;;  %955 = vst.msk [vmem:[%s4024_s1 + $0x490] sm:$0x7f] %vm808_vm0, %v554_v38 }
  0x7e   :  { %956 = vst.msk [vmem:[%s4024_s1 + $0x498] sm:$0x7f] %vm808_vm0, %v555_v39  ;;  %v558_v46 = vmax.f32 %v158_v44, 0.0  ;;  %v559_v47 = vmax.f32 %v159_v45, 0.0  ;;  %v160_v48 = vld [vmem:[%s4023_s0 + $0x4c0] sm:$0x7f] }
  0x7f   :  { %v161_v49 = vld [vmem:[%s4023_s0 + $0x4c8] sm:$0x7f]  ;;  %957 = vst.msk [vmem:[%s4024_s1 + $0x4a0] sm:$0x7f] %vm808_vm0, %v556_v42  ;;  %958 = vst.msk [vmem:[%s4024_s1 + $0x4a8] sm:$0x7f] %vm808_vm0, %v557_v43 }
  0x80   :  { %v560_v50 = vmax.f32 %v160_v48, 0.0  ;;  %v561_v51 = vmax.f32 %v161_v49, 0.0  ;;  %v162_v52 = vld [vmem:[%s4023_s0 + $0x4d0] sm:$0x7f]  ;;  %v163_v53 = vld [vmem:[%s4023_s0 + $0x4d8] sm:$0x7f] }
  0x81   :  { %959 = vst.msk [vmem:[%s4024_s1 + $0x4b0] sm:$0x7f] %vm808_vm0, %v558_v46  ;;  %960 = vst.msk [vmem:[%s4024_s1 + $0x4b8] sm:$0x7f] %vm808_vm0, %v559_v47  ;;  %v562_v54 = vmax.f32 %v162_v52, 0.0  ;;  %v563_v55 = vmax.f32 %v163_v53, 0.0 }
  0x82   :  { %v164_v56 = vld [vmem:[%s4023_s0 + $0x4e0] sm:$0x7f]  ;;  %v165_v57 = vld [vmem:[%s4023_s0 + $0x4e8] sm:$0x7f]  ;;  %961 = vst.msk [vmem:[%s4024_s1 + $0x4c0] sm:$0x7f] %vm808_vm0, %v560_v50 }
  0x83   :  { %962 = vst.msk [vmem:[%s4024_s1 + $0x4c8] sm:$0x7f] %vm808_vm0, %v561_v51  ;;  %v564_v58 = vmax.f32 %v164_v56, 0.0  ;;  %v565_v59 = vmax.f32 %v165_v57, 0.0  ;;  %v166_v60 = vld [vmem:[%s4023_s0 + $0x4f0] sm:$0x7f] }
  0x84   :  { %v167_v61 = vld [vmem:[%s4023_s0 + $0x4f8] sm:$0x7f]  ;;  %963 = vst.msk [vmem:[%s4024_s1 + $0x4d0] sm:$0x7f] %vm808_vm0, %v562_v54  ;;  %964 = vst.msk [vmem:[%s4024_s1 + $0x4d8] sm:$0x7f] %vm808_vm0, %v563_v55 }
  0x85   :  { %v566_v62 = vmax.f32 %v166_v60, 0.0  ;;  %v567_v63 = vmax.f32 %v167_v61, 0.0  ;;  %v168_v0 = vld [vmem:[%s4023_s0 + $0x500] sm:$0x7f]  ;;  %v169_v1 = vld [vmem:[%s4023_s0 + $0x508] sm:$0x7f] }
  0x86   :  { %965 = vst.msk [vmem:[%s4024_s1 + $0x4e0] sm:$0x7f] %vm808_vm0, %v564_v58  ;;  %966 = vst.msk [vmem:[%s4024_s1 + $0x4e8] sm:$0x7f] %vm808_vm0, %v565_v59  ;;  %v568_v2 = vmax.f32 %v168_v0, 0.0  ;;  %v569_v3 = vmax.f32 %v169_v1, 0.0 }
  0x87   :  { %v170_v4 = vld [vmem:[%s4023_s0 + $0x510] sm:$0x7f]  ;;  %v171_v5 = vld [vmem:[%s4023_s0 + $0x518] sm:$0x7f]  ;;  %967 = vst.msk [vmem:[%s4024_s1 + $0x4f0] sm:$0x7f] %vm808_vm0, %v566_v62 }
  0x88   :  { %968 = vst.msk [vmem:[%s4024_s1 + $0x4f8] sm:$0x7f] %vm808_vm0, %v567_v63  ;;  %v570_v6 = vmax.f32 %v170_v4, 0.0  ;;  %v571_v7 = vmax.f32 %v171_v5, 0.0  ;;  %v172_v8 = vld [vmem:[%s4023_s0 + $0x520] sm:$0x7f] }
  0x89   :  { %v173_v9 = vld [vmem:[%s4023_s0 + $0x528] sm:$0x7f]  ;;  %969 = vst.msk [vmem:[%s4024_s1 + $0x500] sm:$0x7f] %vm808_vm0, %v568_v2  ;;  %970 = vst.msk [vmem:[%s4024_s1 + $0x508] sm:$0x7f] %vm808_vm0, %v569_v3 }
  0x8a   :  { %v572_v10 = vmax.f32 %v172_v8, 0.0  ;;  %v573_v11 = vmax.f32 %v173_v9, 0.0  ;;  %v174_v12 = vld [vmem:[%s4023_s0 + $0x530] sm:$0x7f]  ;;  %v175_v13 = vld [vmem:[%s4023_s0 + $0x538] sm:$0x7f] }
  0x8b   :  { %971 = vst.msk [vmem:[%s4024_s1 + $0x510] sm:$0x7f] %vm808_vm0, %v570_v6  ;;  %972 = vst.msk [vmem:[%s4024_s1 + $0x518] sm:$0x7f] %vm808_vm0, %v571_v7  ;;  %v574_v14 = vmax.f32 %v174_v12, 0.0  ;;  %v575_v15 = vmax.f32 %v175_v13, 0.0 }
  0x8c   :  { %v176_v16 = vld [vmem:[%s4023_s0 + $0x540] sm:$0x7f]  ;;  %v177_v17 = vld [vmem:[%s4023_s0 + $0x548] sm:$0x7f]  ;;  %973 = vst.msk [vmem:[%s4024_s1 + $0x520] sm:$0x7f] %vm808_vm0, %v572_v10 }
  0x8d   :  { %974 = vst.msk [vmem:[%s4024_s1 + $0x528] sm:$0x7f] %vm808_vm0, %v573_v11  ;;  %v576_v18 = vmax.f32 %v176_v16, 0.0  ;;  %v577_v19 = vmax.f32 %v177_v17, 0.0  ;;  %v178_v20 = vld [vmem:[%s4023_s0 + $0x550] sm:$0x7f] }
  0x8e   :  { %v179_v21 = vld [vmem:[%s4023_s0 + $0x558] sm:$0x7f]  ;;  %975 = vst.msk [vmem:[%s4024_s1 + $0x530] sm:$0x7f] %vm808_vm0, %v574_v14  ;;  %976 = vst.msk [vmem:[%s4024_s1 + $0x538] sm:$0x7f] %vm808_vm0, %v575_v15 }
  0x8f   :  { %v578_v22 = vmax.f32 %v178_v20, 0.0  ;;  %v579_v23 = vmax.f32 %v179_v21, 0.0  ;;  %v180_v24 = vld [vmem:[%s4023_s0 + $0x560] sm:$0x7f]  ;;  %v181_v25 = vld [vmem:[%s4023_s0 + $0x568] sm:$0x7f] }
  0x90   :  { %977 = vst.msk [vmem:[%s4024_s1 + $0x540] sm:$0x7f] %vm808_vm0, %v576_v18  ;;  %978 = vst.msk [vmem:[%s4024_s1 + $0x548] sm:$0x7f] %vm808_vm0, %v577_v19  ;;  %v580_v26 = vmax.f32 %v180_v24, 0.0  ;;  %v581_v27 = vmax.f32 %v181_v25, 0.0 }
  0x91   :  { %v182_v28 = vld [vmem:[%s4023_s0 + $0x570] sm:$0x7f]  ;;  %v183_v29 = vld [vmem:[%s4023_s0 + $0x578] sm:$0x7f]  ;;  %979 = vst.msk [vmem:[%s4024_s1 + $0x550] sm:$0x7f] %vm808_vm0, %v578_v22 }
  0x92   :  { %980 = vst.msk [vmem:[%s4024_s1 + $0x558] sm:$0x7f] %vm808_vm0, %v579_v23  ;;  %v582_v30 = vmax.f32 %v182_v28, 0.0  ;;  %v583_v31 = vmax.f32 %v183_v29, 0.0  ;;  %v184_v32 = vld [vmem:[%s4023_s0 + $0x580] sm:$0x7f] }
  0x93   :  { %v185_v33 = vld [vmem:[%s4023_s0 + $0x588] sm:$0x7f]  ;;  %981 = vst.msk [vmem:[%s4024_s1 + $0x560] sm:$0x7f] %vm808_vm0, %v580_v26  ;;  %982 = vst.msk [vmem:[%s4024_s1 + $0x568] sm:$0x7f] %vm808_vm0, %v581_v27 }
  0x94   :  { %v584_v34 = vmax.f32 %v184_v32, 0.0  ;;  %v585_v35 = vmax.f32 %v185_v33, 0.0  ;;  %v186_v36 = vld [vmem:[%s4023_s0 + $0x590] sm:$0x7f]  ;;  %v187_v37 = vld [vmem:[%s4023_s0 + $0x598] sm:$0x7f] }
  0x95   :  { %983 = vst.msk [vmem:[%s4024_s1 + $0x570] sm:$0x7f] %vm808_vm0, %v582_v30  ;;  %984 = vst.msk [vmem:[%s4024_s1 + $0x578] sm:$0x7f] %vm808_vm0, %v583_v31  ;;  %v586_v38 = vmax.f32 %v186_v36, 0.0  ;;  %v587_v39 = vmax.f32 %v187_v37, 0.0 }
  0x96   :  { %v188_v40 = vld [vmem:[%s4023_s0 + $0x5a0] sm:$0x7f]  ;;  %v189_v41 = vld [vmem:[%s4023_s0 + $0x5a8] sm:$0x7f]  ;;  %985 = vst.msk [vmem:[%s4024_s1 + $0x580] sm:$0x7f] %vm808_vm0, %v584_v34 }
  0x97   :  { %986 = vst.msk [vmem:[%s4024_s1 + $0x588] sm:$0x7f] %vm808_vm0, %v585_v35  ;;  %v588_v42 = vmax.f32 %v188_v40, 0.0  ;;  %v589_v43 = vmax.f32 %v189_v41, 0.0  ;;  %v190_v44 = vld [vmem:[%s4023_s0 + $0x5b0] sm:$0x7f] }
  0x98   :  { %v191_v45 = vld [vmem:[%s4023_s0 + $0x5b8] sm:$0x7f]  ;;  %987 = vst.msk [vmem:[%s4024_s1 + $0x590] sm:$0x7f] %vm808_vm0, %v586_v38  ;;  %988 = vst.msk [vmem:[%s4024_s1 + $0x598] sm:$0x7f] %vm808_vm0, %v587_v39 }
  0x99   :  { %v590_v46 = vmax.f32 %v190_v44, 0.0  ;;  %v591_v47 = vmax.f32 %v191_v45, 0.0  ;;  %v192_v48 = vld [vmem:[%s4023_s0 + $0x5c0] sm:$0x7f]  ;;  %v193_v49 = vld [vmem:[%s4023_s0 + $0x5c8] sm:$0x7f] }
  0x9a   :  { %989 = vst.msk [vmem:[%s4024_s1 + $0x5a0] sm:$0x7f] %vm808_vm0, %v588_v42  ;;  %990 = vst.msk [vmem:[%s4024_s1 + $0x5a8] sm:$0x7f] %vm808_vm0, %v589_v43  ;;  %v592_v50 = vmax.f32 %v192_v48, 0.0  ;;  %v593_v51 = vmax.f32 %v193_v49, 0.0 }
  0x9b   :  { %v194_v52 = vld [vmem:[%s4023_s0 + $0x5d0] sm:$0x7f]  ;;  %v195_v53 = vld [vmem:[%s4023_s0 + $0x5d8] sm:$0x7f]  ;;  %991 = vst.msk [vmem:[%s4024_s1 + $0x5b0] sm:$0x7f] %vm808_vm0, %v590_v46 }
  0x9c   :  { %992 = vst.msk [vmem:[%s4024_s1 + $0x5b8] sm:$0x7f] %vm808_vm0, %v591_v47  ;;  %v594_v54 = vmax.f32 %v194_v52, 0.0  ;;  %v595_v55 = vmax.f32 %v195_v53, 0.0  ;;  %v196_v56 = vld [vmem:[%s4023_s0 + $0x5e0] sm:$0x7f] }
  0x9d   :  { %v197_v57 = vld [vmem:[%s4023_s0 + $0x5e8] sm:$0x7f]  ;;  %993 = vst.msk [vmem:[%s4024_s1 + $0x5c0] sm:$0x7f] %vm808_vm0, %v592_v50  ;;  %994 = vst.msk [vmem:[%s4024_s1 + $0x5c8] sm:$0x7f] %vm808_vm0, %v593_v51 }
  0x9e   :  { %v596_v58 = vmax.f32 %v196_v56, 0.0  ;;  %v597_v59 = vmax.f32 %v197_v57, 0.0  ;;  %v198_v60 = vld [vmem:[%s4023_s0 + $0x5f0] sm:$0x7f]  ;;  %v199_v61 = vld [vmem:[%s4023_s0 + $0x5f8] sm:$0x7f] }
  0x9f   :  { %995 = vst.msk [vmem:[%s4024_s1 + $0x5d0] sm:$0x7f] %vm808_vm0, %v594_v54  ;;  %996 = vst.msk [vmem:[%s4024_s1 + $0x5d8] sm:$0x7f] %vm808_vm0, %v595_v55  ;;  %v598_v62 = vmax.f32 %v198_v60, 0.0  ;;  %v599_v63 = vmax.f32 %v199_v61, 0.0 }
  0xa0   :  { %v200_v0 = vld [vmem:[%s4023_s0 + $0x600] sm:$0x7f]  ;;  %v201_v1 = vld [vmem:[%s4023_s0 + $0x608] sm:$0x7f]  ;;  %997 = vst.msk [vmem:[%s4024_s1 + $0x5e0] sm:$0x7f] %vm808_vm0, %v596_v58 }
  0xa1   :  { %998 = vst.msk [vmem:[%s4024_s1 + $0x5e8] sm:$0x7f] %vm808_vm0, %v597_v59  ;;  %v600_v2 = vmax.f32 %v200_v0, 0.0  ;;  %v601_v3 = vmax.f32 %v201_v1, 0.0  ;;  %v202_v4 = vld [vmem:[%s4023_s0 + $0x610] sm:$0x7f] }
  0xa2   :  { %v203_v5 = vld [vmem:[%s4023_s0 + $0x618] sm:$0x7f]  ;;  %999 = vst.msk [vmem:[%s4024_s1 + $0x5f0] sm:$0x7f] %vm808_vm0, %v598_v62  ;;  %1000 = vst.msk [vmem:[%s4024_s1 + $0x5f8] sm:$0x7f] %vm808_vm0, %v599_v63 }
  0xa3   :  { %v602_v6 = vmax.f32 %v202_v4, 0.0  ;;  %v603_v7 = vmax.f32 %v203_v5, 0.0  ;;  %v204_v8 = vld [vmem:[%s4023_s0 + $0x620] sm:$0x7f]  ;;  %v205_v9 = vld [vmem:[%s4023_s0 + $0x628] sm:$0x7f] }
  0xa4   :  { %1001 = vst.msk [vmem:[%s4024_s1 + $0x600] sm:$0x7f] %vm808_vm0, %v600_v2  ;;  %1002 = vst.msk [vmem:[%s4024_s1 + $0x608] sm:$0x7f] %vm808_vm0, %v601_v3  ;;  %v604_v10 = vmax.f32 %v204_v8, 0.0  ;;  %v605_v11 = vmax.f32 %v205_v9, 0.0 }
  0xa5   :  { %v206_v12 = vld [vmem:[%s4023_s0 + $0x630] sm:$0x7f]  ;;  %v207_v13 = vld [vmem:[%s4023_s0 + $0x638] sm:$0x7f]  ;;  %1003 = vst.msk [vmem:[%s4024_s1 + $0x610] sm:$0x7f] %vm808_vm0, %v602_v6 }
  0xa6   :  { %1004 = vst.msk [vmem:[%s4024_s1 + $0x618] sm:$0x7f] %vm808_vm0, %v603_v7  ;;  %v606_v14 = vmax.f32 %v206_v12, 0.0  ;;  %v607_v15 = vmax.f32 %v207_v13, 0.0  ;;  %v208_v16 = vld [vmem:[%s4023_s0 + $0x640] sm:$0x7f] }
  0xa7   :  { %v209_v17 = vld [vmem:[%s4023_s0 + $0x648] sm:$0x7f]  ;;  %1005 = vst.msk [vmem:[%s4024_s1 + $0x620] sm:$0x7f] %vm808_vm0, %v604_v10  ;;  %1006 = vst.msk [vmem:[%s4024_s1 + $0x628] sm:$0x7f] %vm808_vm0, %v605_v11 }
  0xa8   :  { %v608_v18 = vmax.f32 %v208_v16, 0.0  ;;  %v609_v19 = vmax.f32 %v209_v17, 0.0  ;;  %v210_v20 = vld [vmem:[%s4023_s0 + $0x650] sm:$0x7f]  ;;  %v211_v21 = vld [vmem:[%s4023_s0 + $0x658] sm:$0x7f] }
  0xa9   :  { %1007 = vst.msk [vmem:[%s4024_s1 + $0x630] sm:$0x7f] %vm808_vm0, %v606_v14  ;;  %1008 = vst.msk [vmem:[%s4024_s1 + $0x638] sm:$0x7f] %vm808_vm0, %v607_v15  ;;  %v610_v22 = vmax.f32 %v210_v20, 0.0  ;;  %v611_v23 = vmax.f32 %v211_v21, 0.0 }
  0xaa   :  { %v212_v24 = vld [vmem:[%s4023_s0 + $0x660] sm:$0x7f]  ;;  %v213_v25 = vld [vmem:[%s4023_s0 + $0x668] sm:$0x7f]  ;;  %1009 = vst.msk [vmem:[%s4024_s1 + $0x640] sm:$0x7f] %vm808_vm0, %v608_v18 }
  0xab   :  { %1010 = vst.msk [vmem:[%s4024_s1 + $0x648] sm:$0x7f] %vm808_vm0, %v609_v19  ;;  %v612_v26 = vmax.f32 %v212_v24, 0.0  ;;  %v613_v27 = vmax.f32 %v213_v25, 0.0  ;;  %v214_v28 = vld [vmem:[%s4023_s0 + $0x670] sm:$0x7f] }
  0xac   :  { %v215_v29 = vld [vmem:[%s4023_s0 + $0x678] sm:$0x7f]  ;;  %1011 = vst.msk [vmem:[%s4024_s1 + $0x650] sm:$0x7f] %vm808_vm0, %v610_v22  ;;  %1012 = vst.msk [vmem:[%s4024_s1 + $0x658] sm:$0x7f] %vm808_vm0, %v611_v23 }
  0xad   :  { %v614_v30 = vmax.f32 %v214_v28, 0.0  ;;  %v615_v31 = vmax.f32 %v215_v29, 0.0  ;;  %v216_v32 = vld [vmem:[%s4023_s0 + $0x680] sm:$0x7f]  ;;  %v217_v33 = vld [vmem:[%s4023_s0 + $0x688] sm:$0x7f] }
  0xae   :  { %1013 = vst.msk [vmem:[%s4024_s1 + $0x660] sm:$0x7f] %vm808_vm0, %v612_v26  ;;  %1014 = vst.msk [vmem:[%s4024_s1 + $0x668] sm:$0x7f] %vm808_vm0, %v613_v27  ;;  %v616_v34 = vmax.f32 %v216_v32, 0.0  ;;  %v617_v35 = vmax.f32 %v217_v33, 0.0 }
  0xaf   :  { %v218_v36 = vld [vmem:[%s4023_s0 + $0x690] sm:$0x7f]  ;;  %v219_v37 = vld [vmem:[%s4023_s0 + $0x698] sm:$0x7f]  ;;  %1015 = vst.msk [vmem:[%s4024_s1 + $0x670] sm:$0x7f] %vm808_vm0, %v614_v30 }
  0xb0   :  { %1016 = vst.msk [vmem:[%s4024_s1 + $0x678] sm:$0x7f] %vm808_vm0, %v615_v31  ;;  %v618_v38 = vmax.f32 %v218_v36, 0.0  ;;  %v619_v39 = vmax.f32 %v219_v37, 0.0  ;;  %v220_v40 = vld [vmem:[%s4023_s0 + $0x6a0] sm:$0x7f] }
  0xb1   :  { %v221_v41 = vld [vmem:[%s4023_s0 + $0x6a8] sm:$0x7f]  ;;  %1017 = vst.msk [vmem:[%s4024_s1 + $0x680] sm:$0x7f] %vm808_vm0, %v616_v34  ;;  %1018 = vst.msk [vmem:[%s4024_s1 + $0x688] sm:$0x7f] %vm808_vm0, %v617_v35 }
  0xb2   :  { %v620_v42 = vmax.f32 %v220_v40, 0.0  ;;  %v621_v43 = vmax.f32 %v221_v41, 0.0  ;;  %v222_v44 = vld [vmem:[%s4023_s0 + $0x6b0] sm:$0x7f]  ;;  %v223_v45 = vld [vmem:[%s4023_s0 + $0x6b8] sm:$0x7f] }
  0xb3   :  { %1019 = vst.msk [vmem:[%s4024_s1 + $0x690] sm:$0x7f] %vm808_vm0, %v618_v38  ;;  %1020 = vst.msk [vmem:[%s4024_s1 + $0x698] sm:$0x7f] %vm808_vm0, %v619_v39  ;;  %v622_v46 = vmax.f32 %v222_v44, 0.0  ;;  %v623_v47 = vmax.f32 %v223_v45, 0.0 }
  0xb4   :  { %v224_v48 = vld [vmem:[%s4023_s0 + $0x6c0] sm:$0x7f]  ;;  %v225_v49 = vld [vmem:[%s4023_s0 + $0x6c8] sm:$0x7f]  ;;  %1021 = vst.msk [vmem:[%s4024_s1 + $0x6a0] sm:$0x7f] %vm808_vm0, %v620_v42 }
  0xb5   :  { %1022 = vst.msk [vmem:[%s4024_s1 + $0x6a8] sm:$0x7f] %vm808_vm0, %v621_v43  ;;  %v624_v50 = vmax.f32 %v224_v48, 0.0  ;;  %v625_v51 = vmax.f32 %v225_v49, 0.0  ;;  %v226_v52 = vld [vmem:[%s4023_s0 + $0x6d0] sm:$0x7f] }
  0xb6   :  { %v227_v53 = vld [vmem:[%s4023_s0 + $0x6d8] sm:$0x7f]  ;;  %1023 = vst.msk [vmem:[%s4024_s1 + $0x6b0] sm:$0x7f] %vm808_vm0, %v622_v46  ;;  %1024 = vst.msk [vmem:[%s4024_s1 + $0x6b8] sm:$0x7f] %vm808_vm0, %v623_v47 }
  0xb7   :  { %v626_v54 = vmax.f32 %v226_v52, 0.0  ;;  %v627_v55 = vmax.f32 %v227_v53, 0.0  ;;  %v228_v56 = vld [vmem:[%s4023_s0 + $0x6e0] sm:$0x7f]  ;;  %v229_v57 = vld [vmem:[%s4023_s0 + $0x6e8] sm:$0x7f] }
  0xb8   :  { %1025 = vst.msk [vmem:[%s4024_s1 + $0x6c0] sm:$0x7f] %vm808_vm0, %v624_v50  ;;  %1026 = vst.msk [vmem:[%s4024_s1 + $0x6c8] sm:$0x7f] %vm808_vm0, %v625_v51  ;;  %v628_v58 = vmax.f32 %v228_v56, 0.0  ;;  %v629_v59 = vmax.f32 %v229_v57, 0.0 }
  0xb9   :  { %v230_v60 = vld [vmem:[%s4023_s0 + $0x6f0] sm:$0x7f]  ;;  %v231_v61 = vld [vmem:[%s4023_s0 + $0x6f8] sm:$0x7f]  ;;  %1027 = vst.msk [vmem:[%s4024_s1 + $0x6d0] sm:$0x7f] %vm808_vm0, %v626_v54 }
  0xba   :  { %1028 = vst.msk [vmem:[%s4024_s1 + $0x6d8] sm:$0x7f] %vm808_vm0, %v627_v55  ;;  %v630_v62 = vmax.f32 %v230_v60, 0.0  ;;  %v631_v63 = vmax.f32 %v231_v61, 0.0  ;;  %v232_v0 = vld [vmem:[%s4023_s0 + $0x700] sm:$0x7f] }
  0xbb   :  { %v233_v1 = vld [vmem:[%s4023_s0 + $0x708] sm:$0x7f]  ;;  %1029 = vst.msk [vmem:[%s4024_s1 + $0x6e0] sm:$0x7f] %vm808_vm0, %v628_v58  ;;  %1030 = vst.msk [vmem:[%s4024_s1 + $0x6e8] sm:$0x7f] %vm808_vm0, %v629_v59 }
  0xbc   :  { %v632_v2 = vmax.f32 %v232_v0, 0.0  ;;  %v633_v3 = vmax.f32 %v233_v1, 0.0  ;;  %v234_v4 = vld [vmem:[%s4023_s0 + $0x710] sm:$0x7f]  ;;  %v235_v5 = vld [vmem:[%s4023_s0 + $0x718] sm:$0x7f] }
  0xbd   :  { %1031 = vst.msk [vmem:[%s4024_s1 + $0x6f0] sm:$0x7f] %vm808_vm0, %v630_v62  ;;  %1032 = vst.msk [vmem:[%s4024_s1 + $0x6f8] sm:$0x7f] %vm808_vm0, %v631_v63  ;;  %v634_v6 = vmax.f32 %v234_v4, 0.0  ;;  %v635_v7 = vmax.f32 %v235_v5, 0.0 }
  0xbe   :  { %v236_v8 = vld [vmem:[%s4023_s0 + $0x720] sm:$0x7f]  ;;  %v237_v9 = vld [vmem:[%s4023_s0 + $0x728] sm:$0x7f]  ;;  %1033 = vst.msk [vmem:[%s4024_s1 + $0x700] sm:$0x7f] %vm808_vm0, %v632_v2 }
  0xbf   :  { %1034 = vst.msk [vmem:[%s4024_s1 + $0x708] sm:$0x7f] %vm808_vm0, %v633_v3  ;;  %v636_v10 = vmax.f32 %v236_v8, 0.0  ;;  %v637_v11 = vmax.f32 %v237_v9, 0.0  ;;  %v238_v12 = vld [vmem:[%s4023_s0 + $0x730] sm:$0x7f] }
  0xc0   :  { %v239_v13 = vld [vmem:[%s4023_s0 + $0x738] sm:$0x7f]  ;;  %1035 = vst.msk [vmem:[%s4024_s1 + $0x710] sm:$0x7f] %vm808_vm0, %v634_v6  ;;  %1036 = vst.msk [vmem:[%s4024_s1 + $0x718] sm:$0x7f] %vm808_vm0, %v635_v7 }
  0xc1   :  { %v638_v14 = vmax.f32 %v238_v12, 0.0  ;;  %v639_v15 = vmax.f32 %v239_v13, 0.0  ;;  %v240_v16 = vld [vmem:[%s4023_s0 + $0x740] sm:$0x7f]  ;;  %v241_v17 = vld [vmem:[%s4023_s0 + $0x748] sm:$0x7f] }
  0xc2   :  { %1037 = vst.msk [vmem:[%s4024_s1 + $0x720] sm:$0x7f] %vm808_vm0, %v636_v10  ;;  %1038 = vst.msk [vmem:[%s4024_s1 + $0x728] sm:$0x7f] %vm808_vm0, %v637_v11  ;;  %v640_v18 = vmax.f32 %v240_v16, 0.0  ;;  %v641_v19 = vmax.f32 %v241_v17, 0.0 }
  0xc3   :  { %v242_v20 = vld [vmem:[%s4023_s0 + $0x750] sm:$0x7f]  ;;  %v243_v21 = vld [vmem:[%s4023_s0 + $0x758] sm:$0x7f]  ;;  %1039 = vst.msk [vmem:[%s4024_s1 + $0x730] sm:$0x7f] %vm808_vm0, %v638_v14 }
  0xc4   :  { %1040 = vst.msk [vmem:[%s4024_s1 + $0x738] sm:$0x7f] %vm808_vm0, %v639_v15  ;;  %v642_v22 = vmax.f32 %v242_v20, 0.0  ;;  %v643_v23 = vmax.f32 %v243_v21, 0.0  ;;  %v244_v24 = vld [vmem:[%s4023_s0 + $0x760] sm:$0x7f] }
  0xc5   :  { %v245_v25 = vld [vmem:[%s4023_s0 + $0x768] sm:$0x7f]  ;;  %1041 = vst.msk [vmem:[%s4024_s1 + $0x740] sm:$0x7f] %vm808_vm0, %v640_v18  ;;  %1042 = vst.msk [vmem:[%s4024_s1 + $0x748] sm:$0x7f] %vm808_vm0, %v641_v19 }
  0xc6   :  { %v644_v26 = vmax.f32 %v244_v24, 0.0  ;;  %v645_v27 = vmax.f32 %v245_v25, 0.0  ;;  %v246_v28 = vld [vmem:[%s4023_s0 + $0x770] sm:$0x7f]  ;;  %v247_v29 = vld [vmem:[%s4023_s0 + $0x778] sm:$0x7f] }
  0xc7   :  { %1043 = vst.msk [vmem:[%s4024_s1 + $0x750] sm:$0x7f] %vm808_vm0, %v642_v22  ;;  %1044 = vst.msk [vmem:[%s4024_s1 + $0x758] sm:$0x7f] %vm808_vm0, %v643_v23  ;;  %v646_v30 = vmax.f32 %v246_v28, 0.0  ;;  %v647_v31 = vmax.f32 %v247_v29, 0.0 }
  0xc8   :  { %v248_v32 = vld [vmem:[%s4023_s0 + $0x780] sm:$0x7f]  ;;  %v249_v33 = vld [vmem:[%s4023_s0 + $0x788] sm:$0x7f]  ;;  %1045 = vst.msk [vmem:[%s4024_s1 + $0x760] sm:$0x7f] %vm808_vm0, %v644_v26 }
  0xc9   :  { %1046 = vst.msk [vmem:[%s4024_s1 + $0x768] sm:$0x7f] %vm808_vm0, %v645_v27  ;;  %v648_v34 = vmax.f32 %v248_v32, 0.0  ;;  %v649_v35 = vmax.f32 %v249_v33, 0.0  ;;  %v250_v36 = vld [vmem:[%s4023_s0 + $0x790] sm:$0x7f] }
  0xca   :  { %v251_v37 = vld [vmem:[%s4023_s0 + $0x798] sm:$0x7f]  ;;  %1047 = vst.msk [vmem:[%s4024_s1 + $0x770] sm:$0x7f] %vm808_vm0, %v646_v30  ;;  %1048 = vst.msk [vmem:[%s4024_s1 + $0x778] sm:$0x7f] %vm808_vm0, %v647_v31 }
  0xcb   :  { %v650_v38 = vmax.f32 %v250_v36, 0.0  ;;  %v651_v39 = vmax.f32 %v251_v37, 0.0  ;;  %v252_v40 = vld [vmem:[%s4023_s0 + $0x7a0] sm:$0x7f]  ;;  %v253_v41 = vld [vmem:[%s4023_s0 + $0x7a8] sm:$0x7f] }
  0xcc   :  { %1049 = vst.msk [vmem:[%s4024_s1 + $0x780] sm:$0x7f] %vm808_vm0, %v648_v34  ;;  %1050 = vst.msk [vmem:[%s4024_s1 + $0x788] sm:$0x7f] %vm808_vm0, %v649_v35  ;;  %v652_v42 = vmax.f32 %v252_v40, 0.0  ;;  %v653_v43 = vmax.f32 %v253_v41, 0.0 }
  0xcd   :  { %v254_v44 = vld [vmem:[%s4023_s0 + $0x7b0] sm:$0x7f]  ;;  %v255_v45 = vld [vmem:[%s4023_s0 + $0x7b8] sm:$0x7f]  ;;  %1051 = vst.msk [vmem:[%s4024_s1 + $0x790] sm:$0x7f] %vm808_vm0, %v650_v38 }
  0xce   :  { %1052 = vst.msk [vmem:[%s4024_s1 + $0x798] sm:$0x7f] %vm808_vm0, %v651_v39  ;;  %v654_v46 = vmax.f32 %v254_v44, 0.0  ;;  %v655_v47 = vmax.f32 %v255_v45, 0.0  ;;  %v256_v48 = vld [vmem:[%s4023_s0 + $0x7c0] sm:$0x7f] }
  0xcf   :  { %v257_v49 = vld [vmem:[%s4023_s0 + $0x7c8] sm:$0x7f]  ;;  %1053 = vst.msk [vmem:[%s4024_s1 + $0x7a0] sm:$0x7f] %vm808_vm0, %v652_v42  ;;  %1054 = vst.msk [vmem:[%s4024_s1 + $0x7a8] sm:$0x7f] %vm808_vm0, %v653_v43 }
  0xd0   :  { %v656_v50 = vmax.f32 %v256_v48, 0.0  ;;  %v657_v51 = vmax.f32 %v257_v49, 0.0  ;;  %v258_v52 = vld [vmem:[%s4023_s0 + $0x7d0] sm:$0x7f]  ;;  %v259_v53 = vld [vmem:[%s4023_s0 + $0x7d8] sm:$0x7f] }
  0xd1   :  { %1055 = vst.msk [vmem:[%s4024_s1 + $0x7b0] sm:$0x7f] %vm808_vm0, %v654_v46  ;;  %1056 = vst.msk [vmem:[%s4024_s1 + $0x7b8] sm:$0x7f] %vm808_vm0, %v655_v47  ;;  %v658_v54 = vmax.f32 %v258_v52, 0.0  ;;  %v659_v55 = vmax.f32 %v259_v53, 0.0 }
  0xd2   :  { %v260_v56 = vld [vmem:[%s4023_s0 + $0x7e0] sm:$0x7f]  ;;  %v261_v57 = vld [vmem:[%s4023_s0 + $0x7e8] sm:$0x7f]  ;;  %1057 = vst.msk [vmem:[%s4024_s1 + $0x7c0] sm:$0x7f] %vm808_vm0, %v656_v50 }
  0xd3   :  { %1058 = vst.msk [vmem:[%s4024_s1 + $0x7c8] sm:$0x7f] %vm808_vm0, %v657_v51  ;;  %v660_v58 = vmax.f32 %v260_v56, 0.0  ;;  %v661_v59 = vmax.f32 %v261_v57, 0.0  ;;  %v262_v60 = vld [vmem:[%s4023_s0 + $0x7f0] sm:$0x7f] }
  0xd4   :  { %v263_v61 = vld [vmem:[%s4023_s0 + $0x7f8] sm:$0x7f]  ;;  %1059 = vst.msk [vmem:[%s4024_s1 + $0x7d0] sm:$0x7f] %vm808_vm0, %v658_v54  ;;  %1060 = vst.msk [vmem:[%s4024_s1 + $0x7d8] sm:$0x7f] %vm808_vm0, %v659_v55 }
  0xd5   :  { %v662_v62 = vmax.f32 %v262_v60, 0.0  ;;  %v663_v63 = vmax.f32 %v263_v61, 0.0  ;;  %v264_v0 = vld [vmem:[%s4023_s0 + $0x800] sm:$0x7f]  ;;  %v265_v1 = vld [vmem:[%s4023_s0 + $0x808] sm:$0x7f] }
  0xd6   :  { %1061 = vst.msk [vmem:[%s4024_s1 + $0x7e0] sm:$0x7f] %vm808_vm0, %v660_v58  ;;  %1062 = vst.msk [vmem:[%s4024_s1 + $0x7e8] sm:$0x7f] %vm808_vm0, %v661_v59  ;;  %v664_v2 = vmax.f32 %v264_v0, 0.0  ;;  %v665_v3 = vmax.f32 %v265_v1, 0.0 }
  0xd7   :  { %v266_v4 = vld [vmem:[%s4023_s0 + $0x810] sm:$0x7f]  ;;  %v267_v5 = vld [vmem:[%s4023_s0 + $0x818] sm:$0x7f]  ;;  %1063 = vst.msk [vmem:[%s4024_s1 + $0x7f0] sm:$0x7f] %vm808_vm0, %v662_v62 }
  0xd8   :  { %1064 = vst.msk [vmem:[%s4024_s1 + $0x7f8] sm:$0x7f] %vm808_vm0, %v663_v63  ;;  %v666_v6 = vmax.f32 %v266_v4, 0.0  ;;  %v667_v7 = vmax.f32 %v267_v5, 0.0  ;;  %v268_v8 = vld [vmem:[%s4023_s0 + $0x820] sm:$0x7f] }
  0xd9   :  { %v269_v9 = vld [vmem:[%s4023_s0 + $0x828] sm:$0x7f]  ;;  %1065 = vst.msk [vmem:[%s4024_s1 + $0x800] sm:$0x7f] %vm808_vm0, %v664_v2  ;;  %1066 = vst.msk [vmem:[%s4024_s1 + $0x808] sm:$0x7f] %vm808_vm0, %v665_v3 }
  0xda   :  { %v668_v10 = vmax.f32 %v268_v8, 0.0  ;;  %v669_v11 = vmax.f32 %v269_v9, 0.0  ;;  %v270_v12 = vld [vmem:[%s4023_s0 + $0x830] sm:$0x7f]  ;;  %v271_v13 = vld [vmem:[%s4023_s0 + $0x838] sm:$0x7f] }
  0xdb   :  { %1067 = vst.msk [vmem:[%s4024_s1 + $0x810] sm:$0x7f] %vm808_vm0, %v666_v6  ;;  %1068 = vst.msk [vmem:[%s4024_s1 + $0x818] sm:$0x7f] %vm808_vm0, %v667_v7  ;;  %v670_v14 = vmax.f32 %v270_v12, 0.0  ;;  %v671_v15 = vmax.f32 %v271_v13, 0.0 }
  0xdc   :  { %v272_v16 = vld [vmem:[%s4023_s0 + $0x840] sm:$0x7f]  ;;  %v273_v17 = vld [vmem:[%s4023_s0 + $0x848] sm:$0x7f]  ;;  %1069 = vst.msk [vmem:[%s4024_s1 + $0x820] sm:$0x7f] %vm808_vm0, %v668_v10 }
  0xdd   :  { %1070 = vst.msk [vmem:[%s4024_s1 + $0x828] sm:$0x7f] %vm808_vm0, %v669_v11  ;;  %v672_v18 = vmax.f32 %v272_v16, 0.0  ;;  %v673_v19 = vmax.f32 %v273_v17, 0.0  ;;  %v274_v20 = vld [vmem:[%s4023_s0 + $0x850] sm:$0x7f] }
  0xde   :  { %v275_v21 = vld [vmem:[%s4023_s0 + $0x858] sm:$0x7f]  ;;  %1071 = vst.msk [vmem:[%s4024_s1 + $0x830] sm:$0x7f] %vm808_vm0, %v670_v14  ;;  %1072 = vst.msk [vmem:[%s4024_s1 + $0x838] sm:$0x7f] %vm808_vm0, %v671_v15 }
  0xdf   :  { %v674_v22 = vmax.f32 %v274_v20, 0.0  ;;  %v675_v23 = vmax.f32 %v275_v21, 0.0  ;;  %v276_v24 = vld [vmem:[%s4023_s0 + $0x860] sm:$0x7f]  ;;  %v277_v25 = vld [vmem:[%s4023_s0 + $0x868] sm:$0x7f] }
  0xe0   :  { %1073 = vst.msk [vmem:[%s4024_s1 + $0x840] sm:$0x7f] %vm808_vm0, %v672_v18  ;;  %1074 = vst.msk [vmem:[%s4024_s1 + $0x848] sm:$0x7f] %vm808_vm0, %v673_v19  ;;  %v676_v26 = vmax.f32 %v276_v24, 0.0  ;;  %v677_v27 = vmax.f32 %v277_v25, 0.0 }
  0xe1   :  { %v278_v28 = vld [vmem:[%s4023_s0 + $0x870] sm:$0x7f]  ;;  %v279_v29 = vld [vmem:[%s4023_s0 + $0x878] sm:$0x7f]  ;;  %1075 = vst.msk [vmem:[%s4024_s1 + $0x850] sm:$0x7f] %vm808_vm0, %v674_v22 }
  0xe2   :  { %1076 = vst.msk [vmem:[%s4024_s1 + $0x858] sm:$0x7f] %vm808_vm0, %v675_v23  ;;  %v678_v30 = vmax.f32 %v278_v28, 0.0  ;;  %v679_v31 = vmax.f32 %v279_v29, 0.0  ;;  %v280_v32 = vld [vmem:[%s4023_s0 + $0x880] sm:$0x7f] }
  0xe3   :  { %v281_v33 = vld [vmem:[%s4023_s0 + $0x888] sm:$0x7f]  ;;  %1077 = vst.msk [vmem:[%s4024_s1 + $0x860] sm:$0x7f] %vm808_vm0, %v676_v26  ;;  %1078 = vst.msk [vmem:[%s4024_s1 + $0x868] sm:$0x7f] %vm808_vm0, %v677_v27 }
  0xe4   :  { %v680_v34 = vmax.f32 %v280_v32, 0.0  ;;  %v681_v35 = vmax.f32 %v281_v33, 0.0  ;;  %v282_v36 = vld [vmem:[%s4023_s0 + $0x890] sm:$0x7f]  ;;  %v283_v37 = vld [vmem:[%s4023_s0 + $0x898] sm:$0x7f] }
  0xe5   :  { %1079 = vst.msk [vmem:[%s4024_s1 + $0x870] sm:$0x7f] %vm808_vm0, %v678_v30  ;;  %1080 = vst.msk [vmem:[%s4024_s1 + $0x878] sm:$0x7f] %vm808_vm0, %v679_v31  ;;  %v682_v38 = vmax.f32 %v282_v36, 0.0  ;;  %v683_v39 = vmax.f32 %v283_v37, 0.0 }
  0xe6   :  { %v284_v40 = vld [vmem:[%s4023_s0 + $0x8a0] sm:$0x7f]  ;;  %v285_v41 = vld [vmem:[%s4023_s0 + $0x8a8] sm:$0x7f]  ;;  %1081 = vst.msk [vmem:[%s4024_s1 + $0x880] sm:$0x7f] %vm808_vm0, %v680_v34 }
  0xe7   :  { %1082 = vst.msk [vmem:[%s4024_s1 + $0x888] sm:$0x7f] %vm808_vm0, %v681_v35  ;;  %v684_v42 = vmax.f32 %v284_v40, 0.0  ;;  %v685_v43 = vmax.f32 %v285_v41, 0.0  ;;  %v286_v44 = vld [vmem:[%s4023_s0 + $0x8b0] sm:$0x7f] }
  0xe8   :  { %v287_v45 = vld [vmem:[%s4023_s0 + $0x8b8] sm:$0x7f]  ;;  %1083 = vst.msk [vmem:[%s4024_s1 + $0x890] sm:$0x7f] %vm808_vm0, %v682_v38  ;;  %1084 = vst.msk [vmem:[%s4024_s1 + $0x898] sm:$0x7f] %vm808_vm0, %v683_v39 }
  0xe9   :  { %v686_v46 = vmax.f32 %v286_v44, 0.0  ;;  %v687_v47 = vmax.f32 %v287_v45, 0.0  ;;  %v288_v48 = vld [vmem:[%s4023_s0 + $0x8c0] sm:$0x7f]  ;;  %v289_v49 = vld [vmem:[%s4023_s0 + $0x8c8] sm:$0x7f] }
  0xea   :  { %1085 = vst.msk [vmem:[%s4024_s1 + $0x8a0] sm:$0x7f] %vm808_vm0, %v684_v42  ;;  %1086 = vst.msk [vmem:[%s4024_s1 + $0x8a8] sm:$0x7f] %vm808_vm0, %v685_v43  ;;  %v688_v50 = vmax.f32 %v288_v48, 0.0  ;;  %v689_v51 = vmax.f32 %v289_v49, 0.0 }
  0xeb   :  { %v290_v52 = vld [vmem:[%s4023_s0 + $0x8d0] sm:$0x7f]  ;;  %v291_v53 = vld [vmem:[%s4023_s0 + $0x8d8] sm:$0x7f]  ;;  %1087 = vst.msk [vmem:[%s4024_s1 + $0x8b0] sm:$0x7f] %vm808_vm0, %v686_v46 }
  0xec   :  { %1088 = vst.msk [vmem:[%s4024_s1 + $0x8b8] sm:$0x7f] %vm808_vm0, %v687_v47  ;;  %v690_v54 = vmax.f32 %v290_v52, 0.0  ;;  %v691_v55 = vmax.f32 %v291_v53, 0.0  ;;  %v292_v56 = vld [vmem:[%s4023_s0 + $0x8e0] sm:$0x7f] }
  0xed   :  { %v293_v57 = vld [vmem:[%s4023_s0 + $0x8e8] sm:$0x7f]  ;;  %1089 = vst.msk [vmem:[%s4024_s1 + $0x8c0] sm:$0x7f] %vm808_vm0, %v688_v50  ;;  %1090 = vst.msk [vmem:[%s4024_s1 + $0x8c8] sm:$0x7f] %vm808_vm0, %v689_v51 }
  0xee   :  { %v692_v58 = vmax.f32 %v292_v56, 0.0  ;;  %v693_v59 = vmax.f32 %v293_v57, 0.0  ;;  %v294_v60 = vld [vmem:[%s4023_s0 + $0x8f0] sm:$0x7f]  ;;  %v295_v61 = vld [vmem:[%s4023_s0 + $0x8f8] sm:$0x7f] }
  0xef   :  { %1091 = vst.msk [vmem:[%s4024_s1 + $0x8d0] sm:$0x7f] %vm808_vm0, %v690_v54  ;;  %1092 = vst.msk [vmem:[%s4024_s1 + $0x8d8] sm:$0x7f] %vm808_vm0, %v691_v55  ;;  %v694_v62 = vmax.f32 %v294_v60, 0.0  ;;  %v695_v63 = vmax.f32 %v295_v61, 0.0 }
  0xf0   :  { %v296_v0 = vld [vmem:[%s4023_s0 + $0x900] sm:$0x7f]  ;;  %v297_v1 = vld [vmem:[%s4023_s0 + $0x908] sm:$0x7f]  ;;  %1093 = vst.msk [vmem:[%s4024_s1 + $0x8e0] sm:$0x7f] %vm808_vm0, %v692_v58 }
  0xf1   :  { %1094 = vst.msk [vmem:[%s4024_s1 + $0x8e8] sm:$0x7f] %vm808_vm0, %v693_v59  ;;  %v696_v2 = vmax.f32 %v296_v0, 0.0  ;;  %v697_v3 = vmax.f32 %v297_v1, 0.0  ;;  %v298_v4 = vld [vmem:[%s4023_s0 + $0x910] sm:$0x7f] }
  0xf2   :  { %v299_v5 = vld [vmem:[%s4023_s0 + $0x918] sm:$0x7f]  ;;  %1095 = vst.msk [vmem:[%s4024_s1 + $0x8f0] sm:$0x7f] %vm808_vm0, %v694_v62  ;;  %1096 = vst.msk [vmem:[%s4024_s1 + $0x8f8] sm:$0x7f] %vm808_vm0, %v695_v63 }
  0xf3   :  { %v698_v6 = vmax.f32 %v298_v4, 0.0  ;;  %v699_v7 = vmax.f32 %v299_v5, 0.0  ;;  %v300_v8 = vld [vmem:[%s4023_s0 + $0x920] sm:$0x7f]  ;;  %v301_v9 = vld [vmem:[%s4023_s0 + $0x928] sm:$0x7f] }
  0xf4   :  { %1097 = vst.msk [vmem:[%s4024_s1 + $0x900] sm:$0x7f] %vm808_vm0, %v696_v2  ;;  %1098 = vst.msk [vmem:[%s4024_s1 + $0x908] sm:$0x7f] %vm808_vm0, %v697_v3  ;;  %v700_v10 = vmax.f32 %v300_v8, 0.0  ;;  %v701_v11 = vmax.f32 %v301_v9, 0.0 }
  0xf5   :  { %v302_v12 = vld [vmem:[%s4023_s0 + $0x930] sm:$0x7f]  ;;  %v303_v13 = vld [vmem:[%s4023_s0 + $0x938] sm:$0x7f]  ;;  %1099 = vst.msk [vmem:[%s4024_s1 + $0x910] sm:$0x7f] %vm808_vm0, %v698_v6 }
  0xf6   :  { %1100 = vst.msk [vmem:[%s4024_s1 + $0x918] sm:$0x7f] %vm808_vm0, %v699_v7  ;;  %v702_v14 = vmax.f32 %v302_v12, 0.0  ;;  %v703_v15 = vmax.f32 %v303_v13, 0.0  ;;  %v304_v16 = vld [vmem:[%s4023_s0 + $0x940] sm:$0x7f] }
  0xf7   :  { %v305_v17 = vld [vmem:[%s4023_s0 + $0x948] sm:$0x7f]  ;;  %1101 = vst.msk [vmem:[%s4024_s1 + $0x920] sm:$0x7f] %vm808_vm0, %v700_v10  ;;  %1102 = vst.msk [vmem:[%s4024_s1 + $0x928] sm:$0x7f] %vm808_vm0, %v701_v11 }
  0xf8   :  { %v704_v18 = vmax.f32 %v304_v16, 0.0  ;;  %v705_v19 = vmax.f32 %v305_v17, 0.0  ;;  %v306_v20 = vld [vmem:[%s4023_s0 + $0x950] sm:$0x7f]  ;;  %v307_v21 = vld [vmem:[%s4023_s0 + $0x958] sm:$0x7f] }
  0xf9   :  { %1103 = vst.msk [vmem:[%s4024_s1 + $0x930] sm:$0x7f] %vm808_vm0, %v702_v14  ;;  %1104 = vst.msk [vmem:[%s4024_s1 + $0x938] sm:$0x7f] %vm808_vm0, %v703_v15  ;;  %v706_v22 = vmax.f32 %v306_v20, 0.0  ;;  %v707_v23 = vmax.f32 %v307_v21, 0.0 }
  0xfa   :  { %v308_v24 = vld [vmem:[%s4023_s0 + $0x960] sm:$0x7f]  ;;  %v309_v25 = vld [vmem:[%s4023_s0 + $0x968] sm:$0x7f]  ;;  %1105 = vst.msk [vmem:[%s4024_s1 + $0x940] sm:$0x7f] %vm808_vm0, %v704_v18 }
  0xfb   :  { %1106 = vst.msk [vmem:[%s4024_s1 + $0x948] sm:$0x7f] %vm808_vm0, %v705_v19  ;;  %v708_v26 = vmax.f32 %v308_v24, 0.0  ;;  %v709_v27 = vmax.f32 %v309_v25, 0.0  ;;  %v310_v28 = vld [vmem:[%s4023_s0 + $0x970] sm:$0x7f] }
  0xfc   :  { %v311_v29 = vld [vmem:[%s4023_s0 + $0x978] sm:$0x7f]  ;;  %1107 = vst.msk [vmem:[%s4024_s1 + $0x950] sm:$0x7f] %vm808_vm0, %v706_v22  ;;  %1108 = vst.msk [vmem:[%s4024_s1 + $0x958] sm:$0x7f] %vm808_vm0, %v707_v23 }
  0xfd   :  { %v710_v30 = vmax.f32 %v310_v28, 0.0  ;;  %v711_v31 = vmax.f32 %v311_v29, 0.0  ;;  %v312_v32 = vld [vmem:[%s4023_s0 + $0x980] sm:$0x7f]  ;;  %v313_v33 = vld [vmem:[%s4023_s0 + $0x988] sm:$0x7f] }
  0xfe   :  { %1109 = vst.msk [vmem:[%s4024_s1 + $0x960] sm:$0x7f] %vm808_vm0, %v708_v26  ;;  %1110 = vst.msk [vmem:[%s4024_s1 + $0x968] sm:$0x7f] %vm808_vm0, %v709_v27  ;;  %v712_v34 = vmax.f32 %v312_v32, 0.0  ;;  %v713_v35 = vmax.f32 %v313_v33, 0.0 }
  0xff   :  { %v314_v36 = vld [vmem:[%s4023_s0 + $0x990] sm:$0x7f]  ;;  %v315_v37 = vld [vmem:[%s4023_s0 + $0x998] sm:$0x7f]  ;;  %1111 = vst.msk [vmem:[%s4024_s1 + $0x970] sm:$0x7f] %vm808_vm0, %v710_v30 }
 0x100   :  { %1112 = vst.msk [vmem:[%s4024_s1 + $0x978] sm:$0x7f] %vm808_vm0, %v711_v31  ;;  %v714_v38 = vmax.f32 %v314_v36, 0.0  ;;  %v715_v39 = vmax.f32 %v315_v37, 0.0  ;;  %v316_v40 = vld [vmem:[%s4023_s0 + $0x9a0] sm:$0x7f] }
 0x101   :  { %v317_v41 = vld [vmem:[%s4023_s0 + $0x9a8] sm:$0x7f]  ;;  %1113 = vst.msk [vmem:[%s4024_s1 + $0x980] sm:$0x7f] %vm808_vm0, %v712_v34  ;;  %1114 = vst.msk [vmem:[%s4024_s1 + $0x988] sm:$0x7f] %vm808_vm0, %v713_v35 }
 0x102   :  { %v716_v42 = vmax.f32 %v316_v40, 0.0  ;;  %v717_v43 = vmax.f32 %v317_v41, 0.0  ;;  %v318_v44 = vld [vmem:[%s4023_s0 + $0x9b0] sm:$0x7f]  ;;  %v319_v45 = vld [vmem:[%s4023_s0 + $0x9b8] sm:$0x7f] }
 0x103   :  { %1115 = vst.msk [vmem:[%s4024_s1 + $0x990] sm:$0x7f] %vm808_vm0, %v714_v38  ;;  %1116 = vst.msk [vmem:[%s4024_s1 + $0x998] sm:$0x7f] %vm808_vm0, %v715_v39  ;;  %v718_v46 = vmax.f32 %v318_v44, 0.0  ;;  %v719_v47 = vmax.f32 %v319_v45, 0.0 }
 0x104   :  { %v320_v48 = vld [vmem:[%s4023_s0 + $0x9c0] sm:$0x7f]  ;;  %v321_v49 = vld [vmem:[%s4023_s0 + $0x9c8] sm:$0x7f]  ;;  %1117 = vst.msk [vmem:[%s4024_s1 + $0x9a0] sm:$0x7f] %vm808_vm0, %v716_v42 }
 0x105   :  { %1118 = vst.msk [vmem:[%s4024_s1 + $0x9a8] sm:$0x7f] %vm808_vm0, %v717_v43  ;;  %v720_v50 = vmax.f32 %v320_v48, 0.0  ;;  %v721_v51 = vmax.f32 %v321_v49, 0.0  ;;  %v322_v52 = vld [vmem:[%s4023_s0 + $0x9d0] sm:$0x7f] }
 0x106   :  { %v323_v53 = vld [vmem:[%s4023_s0 + $0x9d8] sm:$0x7f]  ;;  %1119 = vst.msk [vmem:[%s4024_s1 + $0x9b0] sm:$0x7f] %vm808_vm0, %v718_v46  ;;  %1120 = vst.msk [vmem:[%s4024_s1 + $0x9b8] sm:$0x7f] %vm808_vm0, %v719_v47 }
 0x107   :  { %v722_v54 = vmax.f32 %v322_v52, 0.0  ;;  %v723_v55 = vmax.f32 %v323_v53, 0.0  ;;  %v324_v56 = vld [vmem:[%s4023_s0 + $0x9e0] sm:$0x7f]  ;;  %v325_v57 = vld [vmem:[%s4023_s0 + $0x9e8] sm:$0x7f] }
 0x108   :  { %1121 = vst.msk [vmem:[%s4024_s1 + $0x9c0] sm:$0x7f] %vm808_vm0, %v720_v50  ;;  %1122 = vst.msk [vmem:[%s4024_s1 + $0x9c8] sm:$0x7f] %vm808_vm0, %v721_v51  ;;  %v724_v58 = vmax.f32 %v324_v56, 0.0  ;;  %v725_v59 = vmax.f32 %v325_v57, 0.0 }
 0x109   :  { %v326_v60 = vld [vmem:[%s4023_s0 + $0x9f0] sm:$0x7f]  ;;  %v327_v61 = vld [vmem:[%s4023_s0 + $0x9f8] sm:$0x7f]  ;;  %1123 = vst.msk [vmem:[%s4024_s1 + $0x9d0] sm:$0x7f] %vm808_vm0, %v722_v54 }
 0x10a   :  { %1124 = vst.msk [vmem:[%s4024_s1 + $0x9d8] sm:$0x7f] %vm808_vm0, %v723_v55  ;;  %v726_v62 = vmax.f32 %v326_v60, 0.0  ;;  %v727_v63 = vmax.f32 %v327_v61, 0.0  ;;  %v328_v0 = vld [vmem:[%s4023_s0 + $0xa00] sm:$0x7f] }
 0x10b   :  { %v329_v1 = vld [vmem:[%s4023_s0 + $0xa08] sm:$0x7f]  ;;  %1125 = vst.msk [vmem:[%s4024_s1 + $0x9e0] sm:$0x7f] %vm808_vm0, %v724_v58  ;;  %1126 = vst.msk [vmem:[%s4024_s1 + $0x9e8] sm:$0x7f] %vm808_vm0, %v725_v59 }
 0x10c   :  { %v728_v2 = vmax.f32 %v328_v0, 0.0  ;;  %v729_v3 = vmax.f32 %v329_v1, 0.0  ;;  %v330_v4 = vld [vmem:[%s4023_s0 + $0xa10] sm:$0x7f]  ;;  %v331_v5 = vld [vmem:[%s4023_s0 + $0xa18] sm:$0x7f] }
 0x10d   :  { %1127 = vst.msk [vmem:[%s4024_s1 + $0x9f0] sm:$0x7f] %vm808_vm0, %v726_v62  ;;  %1128 = vst.msk [vmem:[%s4024_s1 + $0x9f8] sm:$0x7f] %vm808_vm0, %v727_v63  ;;  %v730_v6 = vmax.f32 %v330_v4, 0.0  ;;  %v731_v7 = vmax.f32 %v331_v5, 0.0 }
 0x10e   :  { %v332_v8 = vld [vmem:[%s4023_s0 + $0xa20] sm:$0x7f]  ;;  %v333_v9 = vld [vmem:[%s4023_s0 + $0xa28] sm:$0x7f]  ;;  %1129 = vst.msk [vmem:[%s4024_s1 + $0xa00] sm:$0x7f] %vm808_vm0, %v728_v2 }
 0x10f   :  { %1130 = vst.msk [vmem:[%s4024_s1 + $0xa08] sm:$0x7f] %vm808_vm0, %v729_v3  ;;  %v732_v10 = vmax.f32 %v332_v8, 0.0  ;;  %v733_v11 = vmax.f32 %v333_v9, 0.0  ;;  %v334_v12 = vld [vmem:[%s4023_s0 + $0xa30] sm:$0x7f] }
 0x110   :  { %v335_v13 = vld [vmem:[%s4023_s0 + $0xa38] sm:$0x7f]  ;;  %1131 = vst.msk [vmem:[%s4024_s1 + $0xa10] sm:$0x7f] %vm808_vm0, %v730_v6  ;;  %1132 = vst.msk [vmem:[%s4024_s1 + $0xa18] sm:$0x7f] %vm808_vm0, %v731_v7 }
 0x111   :  { %v734_v14 = vmax.f32 %v334_v12, 0.0  ;;  %v735_v15 = vmax.f32 %v335_v13, 0.0  ;;  %v336_v16 = vld [vmem:[%s4023_s0 + $0xa40] sm:$0x7f]  ;;  %v337_v17 = vld [vmem:[%s4023_s0 + $0xa48] sm:$0x7f] }
 0x112   :  { %1133 = vst.msk [vmem:[%s4024_s1 + $0xa20] sm:$0x7f] %vm808_vm0, %v732_v10  ;;  %1134 = vst.msk [vmem:[%s4024_s1 + $0xa28] sm:$0x7f] %vm808_vm0, %v733_v11  ;;  %v736_v18 = vmax.f32 %v336_v16, 0.0  ;;  %v737_v19 = vmax.f32 %v337_v17, 0.0 }
 0x113   :  { %v338_v20 = vld [vmem:[%s4023_s0 + $0xa50] sm:$0x7f]  ;;  %v339_v21 = vld [vmem:[%s4023_s0 + $0xa58] sm:$0x7f]  ;;  %1135 = vst.msk [vmem:[%s4024_s1 + $0xa30] sm:$0x7f] %vm808_vm0, %v734_v14 }
 0x114   :  { %1136 = vst.msk [vmem:[%s4024_s1 + $0xa38] sm:$0x7f] %vm808_vm0, %v735_v15  ;;  %v738_v22 = vmax.f32 %v338_v20, 0.0  ;;  %v739_v23 = vmax.f32 %v339_v21, 0.0  ;;  %v340_v24 = vld [vmem:[%s4023_s0 + $0xa60] sm:$0x7f] }
 0x115   :  { %v341_v25 = vld [vmem:[%s4023_s0 + $0xa68] sm:$0x7f]  ;;  %1137 = vst.msk [vmem:[%s4024_s1 + $0xa40] sm:$0x7f] %vm808_vm0, %v736_v18  ;;  %1138 = vst.msk [vmem:[%s4024_s1 + $0xa48] sm:$0x7f] %vm808_vm0, %v737_v19 }
 0x116   :  { %v740_v26 = vmax.f32 %v340_v24, 0.0  ;;  %v741_v27 = vmax.f32 %v341_v25, 0.0  ;;  %v342_v28 = vld [vmem:[%s4023_s0 + $0xa70] sm:$0x7f]  ;;  %v343_v29 = vld [vmem:[%s4023_s0 + $0xa78] sm:$0x7f] }
 0x117   :  { %1139 = vst.msk [vmem:[%s4024_s1 + $0xa50] sm:$0x7f] %vm808_vm0, %v738_v22  ;;  %1140 = vst.msk [vmem:[%s4024_s1 + $0xa58] sm:$0x7f] %vm808_vm0, %v739_v23  ;;  %v742_v30 = vmax.f32 %v342_v28, 0.0  ;;  %v743_v31 = vmax.f32 %v343_v29, 0.0 }
 0x118   :  { %v344_v32 = vld [vmem:[%s4023_s0 + $0xa80] sm:$0x7f]  ;;  %v345_v33 = vld [vmem:[%s4023_s0 + $0xa88] sm:$0x7f]  ;;  %1141 = vst.msk [vmem:[%s4024_s1 + $0xa60] sm:$0x7f] %vm808_vm0, %v740_v26 }
 0x119   :  { %1142 = vst.msk [vmem:[%s4024_s1 + $0xa68] sm:$0x7f] %vm808_vm0, %v741_v27  ;;  %v744_v34 = vmax.f32 %v344_v32, 0.0  ;;  %v745_v35 = vmax.f32 %v345_v33, 0.0  ;;  %v346_v36 = vld [vmem:[%s4023_s0 + $0xa90] sm:$0x7f] }
 0x11a   :  { %v347_v37 = vld [vmem:[%s4023_s0 + $0xa98] sm:$0x7f]  ;;  %1143 = vst.msk [vmem:[%s4024_s1 + $0xa70] sm:$0x7f] %vm808_vm0, %v742_v30  ;;  %1144 = vst.msk [vmem:[%s4024_s1 + $0xa78] sm:$0x7f] %vm808_vm0, %v743_v31 }
 0x11b   :  { %v746_v38 = vmax.f32 %v346_v36, 0.0  ;;  %v747_v39 = vmax.f32 %v347_v37, 0.0  ;;  %v348_v40 = vld [vmem:[%s4023_s0 + $0xaa0] sm:$0x7f]  ;;  %v349_v41 = vld [vmem:[%s4023_s0 + $0xaa8] sm:$0x7f] }
 0x11c   :  { %1145 = vst.msk [vmem:[%s4024_s1 + $0xa80] sm:$0x7f] %vm808_vm0, %v744_v34  ;;  %1146 = vst.msk [vmem:[%s4024_s1 + $0xa88] sm:$0x7f] %vm808_vm0, %v745_v35  ;;  %v748_v42 = vmax.f32 %v348_v40, 0.0  ;;  %v749_v43 = vmax.f32 %v349_v41, 0.0 }
 0x11d   :  { %v350_v44 = vld [vmem:[%s4023_s0 + $0xab0] sm:$0x7f]  ;;  %v351_v45 = vld [vmem:[%s4023_s0 + $0xab8] sm:$0x7f]  ;;  %1147 = vst.msk [vmem:[%s4024_s1 + $0xa90] sm:$0x7f] %vm808_vm0, %v746_v38 }
 0x11e   :  { %1148 = vst.msk [vmem:[%s4024_s1 + $0xa98] sm:$0x7f] %vm808_vm0, %v747_v39  ;;  %v750_v46 = vmax.f32 %v350_v44, 0.0  ;;  %v751_v47 = vmax.f32 %v351_v45, 0.0  ;;  %v352_v48 = vld [vmem:[%s4023_s0 + $0xac0] sm:$0x7f] }
 0x11f   :  { %v353_v49 = vld [vmem:[%s4023_s0 + $0xac8] sm:$0x7f]  ;;  %1149 = vst.msk [vmem:[%s4024_s1 + $0xaa0] sm:$0x7f] %vm808_vm0, %v748_v42  ;;  %1150 = vst.msk [vmem:[%s4024_s1 + $0xaa8] sm:$0x7f] %vm808_vm0, %v749_v43 }
 0x120   :  { %v752_v50 = vmax.f32 %v352_v48, 0.0  ;;  %v753_v51 = vmax.f32 %v353_v49, 0.0  ;;  %v354_v52 = vld [vmem:[%s4023_s0 + $0xad0] sm:$0x7f]  ;;  %v355_v53 = vld [vmem:[%s4023_s0 + $0xad8] sm:$0x7f] }
 0x121   :  { %1151 = vst.msk [vmem:[%s4024_s1 + $0xab0] sm:$0x7f] %vm808_vm0, %v750_v46  ;;  %1152 = vst.msk [vmem:[%s4024_s1 + $0xab8] sm:$0x7f] %vm808_vm0, %v751_v47  ;;  %v754_v54 = vmax.f32 %v354_v52, 0.0  ;;  %v755_v55 = vmax.f32 %v355_v53, 0.0 }
 0x122   :  { %v356_v56 = vld [vmem:[%s4023_s0 + $0xae0] sm:$0x7f]  ;;  %v357_v57 = vld [vmem:[%s4023_s0 + $0xae8] sm:$0x7f]  ;;  %1153 = vst.msk [vmem:[%s4024_s1 + $0xac0] sm:$0x7f] %vm808_vm0, %v752_v50 }
 0x123   :  { %1154 = vst.msk [vmem:[%s4024_s1 + $0xac8] sm:$0x7f] %vm808_vm0, %v753_v51  ;;  %v756_v58 = vmax.f32 %v356_v56, 0.0  ;;  %v757_v59 = vmax.f32 %v357_v57, 0.0  ;;  %v358_v60 = vld [vmem:[%s4023_s0 + $0xaf0] sm:$0x7f] }
 0x124   :  { %v359_v61 = vld [vmem:[%s4023_s0 + $0xaf8] sm:$0x7f]  ;;  %1155 = vst.msk [vmem:[%s4024_s1 + $0xad0] sm:$0x7f] %vm808_vm0, %v754_v54  ;;  %1156 = vst.msk [vmem:[%s4024_s1 + $0xad8] sm:$0x7f] %vm808_vm0, %v755_v55 }
 0x125   :  { %v758_v62 = vmax.f32 %v358_v60, 0.0  ;;  %v759_v63 = vmax.f32 %v359_v61, 0.0  ;;  %v360_v0 = vld [vmem:[%s4023_s0 + $0xb00] sm:$0x7f]  ;;  %v361_v1 = vld [vmem:[%s4023_s0 + $0xb08] sm:$0x7f] }
 0x126   :  { %1157 = vst.msk [vmem:[%s4024_s1 + $0xae0] sm:$0x7f] %vm808_vm0, %v756_v58  ;;  %1158 = vst.msk [vmem:[%s4024_s1 + $0xae8] sm:$0x7f] %vm808_vm0, %v757_v59  ;;  %v760_v2 = vmax.f32 %v360_v0, 0.0  ;;  %v761_v3 = vmax.f32 %v361_v1, 0.0 }
 0x127   :  { %v362_v4 = vld [vmem:[%s4023_s0 + $0xb10] sm:$0x7f]  ;;  %v363_v5 = vld [vmem:[%s4023_s0 + $0xb18] sm:$0x7f]  ;;  %1159 = vst.msk [vmem:[%s4024_s1 + $0xaf0] sm:$0x7f] %vm808_vm0, %v758_v62 }
 0x128   :  { %1160 = vst.msk [vmem:[%s4024_s1 + $0xaf8] sm:$0x7f] %vm808_vm0, %v759_v63  ;;  %v762_v6 = vmax.f32 %v362_v4, 0.0  ;;  %v763_v7 = vmax.f32 %v363_v5, 0.0  ;;  %v364_v8 = vld [vmem:[%s4023_s0 + $0xb20] sm:$0x7f] }
 0x129   :  { %v365_v9 = vld [vmem:[%s4023_s0 + $0xb28] sm:$0x7f]  ;;  %1161 = vst.msk [vmem:[%s4024_s1 + $0xb00] sm:$0x7f] %vm808_vm0, %v760_v2  ;;  %1162 = vst.msk [vmem:[%s4024_s1 + $0xb08] sm:$0x7f] %vm808_vm0, %v761_v3 }
 0x12a   :  { %v764_v10 = vmax.f32 %v364_v8, 0.0  ;;  %v765_v11 = vmax.f32 %v365_v9, 0.0  ;;  %v366_v12 = vld [vmem:[%s4023_s0 + $0xb30] sm:$0x7f]  ;;  %v367_v13 = vld [vmem:[%s4023_s0 + $0xb38] sm:$0x7f] }
 0x12b   :  { %1163 = vst.msk [vmem:[%s4024_s1 + $0xb10] sm:$0x7f] %vm808_vm0, %v762_v6  ;;  %1164 = vst.msk [vmem:[%s4024_s1 + $0xb18] sm:$0x7f] %vm808_vm0, %v763_v7  ;;  %v766_v14 = vmax.f32 %v366_v12, 0.0  ;;  %v767_v15 = vmax.f32 %v367_v13, 0.0 }
 0x12c   :  { %v368_v16 = vld [vmem:[%s4023_s0 + $0xb40] sm:$0x7f]  ;;  %v369_v17 = vld [vmem:[%s4023_s0 + $0xb48] sm:$0x7f]  ;;  %1165 = vst.msk [vmem:[%s4024_s1 + $0xb20] sm:$0x7f] %vm808_vm0, %v764_v10 }
 0x12d   :  { %1166 = vst.msk [vmem:[%s4024_s1 + $0xb28] sm:$0x7f] %vm808_vm0, %v765_v11  ;;  %v768_v18 = vmax.f32 %v368_v16, 0.0  ;;  %v769_v19 = vmax.f32 %v369_v17, 0.0  ;;  %v370_v20 = vld [vmem:[%s4023_s0 + $0xb50] sm:$0x7f] }
 0x12e   :  { %v371_v21 = vld [vmem:[%s4023_s0 + $0xb58] sm:$0x7f]  ;;  %1167 = vst.msk [vmem:[%s4024_s1 + $0xb30] sm:$0x7f] %vm808_vm0, %v766_v14  ;;  %1168 = vst.msk [vmem:[%s4024_s1 + $0xb38] sm:$0x7f] %vm808_vm0, %v767_v15 }
 0x12f   :  { %v770_v22 = vmax.f32 %v370_v20, 0.0  ;;  %v771_v23 = vmax.f32 %v371_v21, 0.0  ;;  %v372_v24 = vld [vmem:[%s4023_s0 + $0xb60] sm:$0x7f]  ;;  %v373_v25 = vld [vmem:[%s4023_s0 + $0xb68] sm:$0x7f] }
 0x130   :  { %1169 = vst.msk [vmem:[%s4024_s1 + $0xb40] sm:$0x7f] %vm808_vm0, %v768_v18  ;;  %1170 = vst.msk [vmem:[%s4024_s1 + $0xb48] sm:$0x7f] %vm808_vm0, %v769_v19  ;;  %v772_v26 = vmax.f32 %v372_v24, 0.0  ;;  %v773_v27 = vmax.f32 %v373_v25, 0.0 }
 0x131   :  { %v374_v28 = vld [vmem:[%s4023_s0 + $0xb70] sm:$0x7f]  ;;  %v375_v29 = vld [vmem:[%s4023_s0 + $0xb78] sm:$0x7f]  ;;  %1171 = vst.msk [vmem:[%s4024_s1 + $0xb50] sm:$0x7f] %vm808_vm0, %v770_v22 }
 0x132   :  { %1172 = vst.msk [vmem:[%s4024_s1 + $0xb58] sm:$0x7f] %vm808_vm0, %v771_v23  ;;  %v774_v30 = vmax.f32 %v374_v28, 0.0  ;;  %v775_v31 = vmax.f32 %v375_v29, 0.0  ;;  %v376_v32 = vld [vmem:[%s4023_s0 + $0xb80] sm:$0x7f] }
 0x133   :  { %v377_v33 = vld [vmem:[%s4023_s0 + $0xb88] sm:$0x7f]  ;;  %1173 = vst.msk [vmem:[%s4024_s1 + $0xb60] sm:$0x7f] %vm808_vm0, %v772_v26  ;;  %1174 = vst.msk [vmem:[%s4024_s1 + $0xb68] sm:$0x7f] %vm808_vm0, %v773_v27 }
 0x134   :  { %v776_v34 = vmax.f32 %v376_v32, 0.0  ;;  %v777_v35 = vmax.f32 %v377_v33, 0.0  ;;  %v378_v36 = vld [vmem:[%s4023_s0 + $0xb90] sm:$0x7f]  ;;  %v379_v37 = vld [vmem:[%s4023_s0 + $0xb98] sm:$0x7f] }
 0x135   :  { %1175 = vst.msk [vmem:[%s4024_s1 + $0xb70] sm:$0x7f] %vm808_vm0, %v774_v30  ;;  %1176 = vst.msk [vmem:[%s4024_s1 + $0xb78] sm:$0x7f] %vm808_vm0, %v775_v31  ;;  %v778_v38 = vmax.f32 %v378_v36, 0.0  ;;  %v779_v39 = vmax.f32 %v379_v37, 0.0 }
 0x136   :  { %v380_v40 = vld [vmem:[%s4023_s0 + $0xba0] sm:$0x7f]  ;;  %v381_v41 = vld [vmem:[%s4023_s0 + $0xba8] sm:$0x7f]  ;;  %1177 = vst.msk [vmem:[%s4024_s1 + $0xb80] sm:$0x7f] %vm808_vm0, %v776_v34 }
 0x137   :  { %1178 = vst.msk [vmem:[%s4024_s1 + $0xb88] sm:$0x7f] %vm808_vm0, %v777_v35  ;;  %v780_v42 = vmax.f32 %v380_v40, 0.0  ;;  %v781_v43 = vmax.f32 %v381_v41, 0.0  ;;  %v382_v44 = vld [vmem:[%s4023_s0 + $0xbb0] sm:$0x7f] }
 0x138   :  { %v383_v45 = vld [vmem:[%s4023_s0 + $0xbb8] sm:$0x7f]  ;;  %1179 = vst.msk [vmem:[%s4024_s1 + $0xb90] sm:$0x7f] %vm808_vm0, %v778_v38  ;;  %1180 = vst.msk [vmem:[%s4024_s1 + $0xb98] sm:$0x7f] %vm808_vm0, %v779_v39 }
 0x139   :  { %v782_v46 = vmax.f32 %v382_v44, 0.0  ;;  %v783_v47 = vmax.f32 %v383_v45, 0.0  ;;  %v384_v48 = vld [vmem:[%s4023_s0 + $0xbc0] sm:$0x7f]  ;;  %v385_v49 = vld [vmem:[%s4023_s0 + $0xbc8] sm:$0x7f] }
 0x13a   :  { %1181 = vst.msk [vmem:[%s4024_s1 + $0xba0] sm:$0x7f] %vm808_vm0, %v780_v42  ;;  %1182 = vst.msk [vmem:[%s4024_s1 + $0xba8] sm:$0x7f] %vm808_vm0, %v781_v43  ;;  %v784_v50 = vmax.f32 %v384_v48, 0.0  ;;  %v785_v51 = vmax.f32 %v385_v49, 0.0 }
 0x13b   :  { %v386_v52 = vld [vmem:[%s4023_s0 + $0xbd0] sm:$0x7f]  ;;  %v387_v53 = vld [vmem:[%s4023_s0 + $0xbd8] sm:$0x7f]  ;;  %1183 = vst.msk [vmem:[%s4024_s1 + $0xbb0] sm:$0x7f] %vm808_vm0, %v782_v46 }
 0x13c   :  { %1184 = vst.msk [vmem:[%s4024_s1 + $0xbb8] sm:$0x7f] %vm808_vm0, %v783_v47  ;;  %v786_v54 = vmax.f32 %v386_v52, 0.0  ;;  %v787_v55 = vmax.f32 %v387_v53, 0.0  ;;  %v388_v56 = vld [vmem:[%s4023_s0 + $0xbe0] sm:$0x7f] }
 0x13d   :  { %v389_v57 = vld [vmem:[%s4023_s0 + $0xbe8] sm:$0x7f]  ;;  %1185 = vst.msk [vmem:[%s4024_s1 + $0xbc0] sm:$0x7f] %vm808_vm0, %v784_v50  ;;  %1186 = vst.msk [vmem:[%s4024_s1 + $0xbc8] sm:$0x7f] %vm808_vm0, %v785_v51 }
 0x13e   :  { %v788_v58 = vmax.f32 %v388_v56, 0.0  ;;  %v789_v59 = vmax.f32 %v389_v57, 0.0  ;;  %v390_v60 = vld [vmem:[%s4023_s0 + $0xbf0] sm:$0x7f]  ;;  %v391_v61 = vld [vmem:[%s4023_s0 + $0xbf8] sm:$0x7f] }
 0x13f   :  { %1187 = vst.msk [vmem:[%s4024_s1 + $0xbd0] sm:$0x7f] %vm808_vm0, %v786_v54  ;;  %1188 = vst.msk [vmem:[%s4024_s1 + $0xbd8] sm:$0x7f] %vm808_vm0, %v787_v55  ;;  %v790_v62 = vmax.f32 %v390_v60, 0.0  ;;  %v791_v63 = vmax.f32 %v391_v61, 0.0 }
 0x140   :  { %v392_v0 = vld [vmem:[%s4023_s0 + $0xc00] sm:$0x7f]  ;;  %v393_v1 = vld [vmem:[%s4023_s0 + $0xc08] sm:$0x7f]  ;;  %1189 = vst.msk [vmem:[%s4024_s1 + $0xbe0] sm:$0x7f] %vm808_vm0, %v788_v58 }
 0x141   :  { %1190 = vst.msk [vmem:[%s4024_s1 + $0xbe8] sm:$0x7f] %vm808_vm0, %v789_v59  ;;  %v792_v2 = vmax.f32 %v392_v0, 0.0  ;;  %v793_v3 = vmax.f32 %v393_v1, 0.0  ;;  %v394_v4 = vld [vmem:[%s4023_s0 + $0xc10] sm:$0x7f] }
 0x142   :  { %v395_v5 = vld [vmem:[%s4023_s0 + $0xc18] sm:$0x7f]  ;;  %1191 = vst.msk [vmem:[%s4024_s1 + $0xbf0] sm:$0x7f] %vm808_vm0, %v790_v62  ;;  %1192 = vst.msk [vmem:[%s4024_s1 + $0xbf8] sm:$0x7f] %vm808_vm0, %v791_v63 }
 0x143   :  { %v794_v6 = vmax.f32 %v394_v4, 0.0  ;;  %v795_v7 = vmax.f32 %v395_v5, 0.0  ;;  %v396_v8 = vld [vmem:[%s4023_s0 + $0xc20] sm:$0x7f]  ;;  %v397_v9 = vld [vmem:[%s4023_s0 + $0xc28] sm:$0x7f] }
 0x144   :  { %1193 = vst.msk [vmem:[%s4024_s1 + $0xc00] sm:$0x7f] %vm808_vm0, %v792_v2  ;;  %1194 = vst.msk [vmem:[%s4024_s1 + $0xc08] sm:$0x7f] %vm808_vm0, %v793_v3  ;;  %v796_v10 = vmax.f32 %v396_v8, 0.0  ;;  %v797_v11 = vmax.f32 %v397_v9, 0.0 }
 0x145   :  { %v398_v12 = vld [vmem:[%s4023_s0 + $0xc30] sm:$0x7f]  ;;  %v399_v13 = vld [vmem:[%s4023_s0 + $0xc38] sm:$0x7f]  ;;  %1195 = vst.msk [vmem:[%s4024_s1 + $0xc10] sm:$0x7f] %vm808_vm0, %v794_v6 }
 0x146   :  { %1196 = vst.msk [vmem:[%s4024_s1 + $0xc18] sm:$0x7f] %vm808_vm0, %v795_v7  ;;  %v798_v14 = vmax.f32 %v398_v12, 0.0  ;;  %v799_v15 = vmax.f32 %v399_v13, 0.0  ;;  %v400_v16 = vld [vmem:[%s4023_s0 + $0xc40] sm:$0x7f] }
 0x147   :  { %v401_v17 = vld [vmem:[%s4023_s0 + $0xc48] sm:$0x7f]  ;;  %1197 = vst.msk [vmem:[%s4024_s1 + $0xc20] sm:$0x7f] %vm808_vm0, %v796_v10  ;;  %1198 = vst.msk [vmem:[%s4024_s1 + $0xc28] sm:$0x7f] %vm808_vm0, %v797_v11 }
 0x148   :  { %v800_v18 = vmax.f32 %v400_v16, 0.0  ;;  %v801_v19 = vmax.f32 %v401_v17, 0.0  ;;  %v402_v20 = vld [vmem:[%s4023_s0 + $0xc50] sm:$0x7f]  ;;  %v403_v21 = vld [vmem:[%s4023_s0 + $0xc58] sm:$0x7f] }
 0x149   :  { %1199 = vst.msk [vmem:[%s4024_s1 + $0xc30] sm:$0x7f] %vm808_vm0, %v798_v14  ;;  %1200 = vst.msk [vmem:[%s4024_s1 + $0xc38] sm:$0x7f] %vm808_vm0, %v799_v15  ;;  %v802_v22 = vmax.f32 %v402_v20, 0.0  ;;  %v803_v23 = vmax.f32 %v403_v21, 0.0 }
 0x14a   :  { %v404_v24 = vld [vmem:[%s4023_s0 + $0xc60] sm:$0x7f]  ;;  %v405_v25 = vld [vmem:[%s4023_s0 + $0xc68] sm:$0x7f]  ;;  %1201 = vst.msk [vmem:[%s4024_s1 + $0xc40] sm:$0x7f] %vm808_vm0, %v800_v18 }
 0x14b   :  { %1202 = vst.msk [vmem:[%s4024_s1 + $0xc48] sm:$0x7f] %vm808_vm0, %v801_v19  ;;  %v804_v26 = vmax.f32 %v404_v24, 0.0  ;;  %v805_v27 = vmax.f32 %v405_v25, 0.0  ;;  %v406_v28 = vld [vmem:[%s4023_s0 + $0xc70] sm:$0x7f] }
 0x14c   :  { %v407_v29 = vld [vmem:[%s4023_s0 + $0xc78] sm:$0x7f]  ;;  %1203 = vst.msk [vmem:[%s4024_s1 + $0xc50] sm:$0x7f] %vm808_vm0, %v802_v22  ;;  %1204 = vst.msk [vmem:[%s4024_s1 + $0xc58] sm:$0x7f] %vm808_vm0, %v803_v23 }
 0x14d   :  { %v806_v30 = vmax.f32 %v406_v28, 0.0  ;;  %v807_v31 = vmax.f32 %v407_v29, 0.0  ;;  %1205 = vst.msk [vmem:[%s4024_s1 + $0xc60] sm:$0x7f] %vm808_vm0, %v804_v26  ;;  %1206 = vst.msk [vmem:[%s4024_s1 + $0xc68] sm:$0x7f] %vm808_vm0, %v805_v27 }
 0x14f   :  { %1207 = vst.msk [vmem:[%s4024_s1 + $0xc70] sm:$0x7f] %vm808_vm0, %v806_v30  ;;  %1208 = vst.msk [vmem:[%s4024_s1 + $0xc78] sm:$0x7f] %vm808_vm0, %v807_v31 }

</bundles_post_ra>
